<compile_context>
chip_gen: v6e
topology: v6e:2x2x1
jax: 0.10.0
libtpu: 0.0.40
codegen_flags: <defaults>
</compile_context>

<pallas_src>
import functools

import jax
import jax.numpy as jnp
import numpy as np
from jax.experimental import pallas as pl
from jax.experimental.pallas import tpu as pltpu

LEAKY_SLOPE = 0.1
# Explicit scoped-VMEM budget: > v5e's 16 MiB default, <= v7x's 64 MiB physical.
VMEM_LIMIT_BYTES = 32 * 1024 * 1024


# ---------------------------------------------------------------------------
# Pallas kernel: fused stride-1 conv (sum of shifted matmuls) + bias + LeakyReLU
# ---------------------------------------------------------------------------
def _make_conv_kernel(tap_offsets, m_rows, leaky_slope):
    def kernel(x_ref, w_ref, b_ref, o_ref):
        # x_ref: (1, Hp*Wp, Cin_eff) bf16  -- one padded, space-to-depth image
        # w_ref: (taps, Cin_eff, Cout) bf16
        # b_ref: (1, Cout) f32
        # o_ref: (1, m_rows, Cout) bf16
        acc = None
        for t, off in enumerate(tap_offsets):
            win = x_ref[0, off:off + m_rows, :]            # (m_rows, Cin_eff) bf16
            part = jnp.dot(win, w_ref[t],
                           preferred_element_type=jnp.float32)
            acc = part if acc is None else acc + part
        acc = acc + b_ref[...]                             # (1, Cout) broadcast
        o_ref[0] = jnp.where(acc > 0, acc, leaky_slope * acc).astype(o_ref.dtype)
    return kernel


# ---------------------------------------------------------------------------
# Conv layer: JAX layout plumbing (1x copy) + one pallas_call per layer
# ---------------------------------------------------------------------------
def conv2d_leaky(x_nhwc, w, b, *, stride, padding):
    """x_nhwc: (N,H,W,Cin) bf16; w: (Cout,Cin,K,K) f32 (torch layout); b: (Cout,)."""
    N, H, W, Cin = x_nhwc.shape
    Cout, _, KH, KW = w.shape
    assert KH == KW
    k, s, p = KH, stride, padding
    OH = (H + 2 * p - k) // s + 1
    OW = (W + 2 * p - k) // s + 1
    k_eff = -(-k // s)                                     # ceil(k/s)
    # Per-phase (space-to-depth) canvas geometry.  Hp has one extra row so the
    # flattened tap windows never run past the end of the image.
    Hp = max(OH + k_eff, -(-(H + 2 * p) // s))
    Wp = max(OW + k_eff - 1, -(-(W + 2 * p) // s))
    Cin_eff = s * s * Cin

    # ---- input: pad + space-to-depth + flatten spatial (single 1x copy) ----
    canvas = jnp.pad(x_nhwc, ((0, 0),
                              (p, s * Hp - p - H),
                              (p, s * Wp - p - W),
                              (0, 0)))
    x_eff = canvas.reshape(N, Hp, s, Wp, s, Cin)
    x_eff = x_eff.transpose(0, 1, 3, 2, 4, 5).reshape(N, Hp * Wp, Cin_eff)
    x_eff = x_eff.astype(jnp.bfloat16)

    # ---- weights: (Cout,Cin,k,k) -> (taps, s*s*Cin, Cout), zero phantom taps ----
    w_pad = jnp.pad(w, ((0, 0), (0, 0),
                        (0, s * k_eff - k), (0, s * k_eff - k)))
    w_eff = w_pad.reshape(Cout, Cin, k_eff, s, k_eff, s)
    w_eff = w_eff.transpose(2, 4, 3, 5, 1, 0).reshape(k_eff * k_eff, Cin_eff, Cout)
    w_eff = w_eff.astype(jnp.bfloat16)
    bias2d = b.reshape(1, Cout).astype(jnp.float32)

    M = OH * Wp                                            # rows/image (incl. junk cols)
    tap_offsets = [qh * Wp + qw for qh in range(k_eff) for qw in range(k_eff)]
    taps = len(tap_offsets)

    kernel = _make_conv_kernel(tap_offsets, M, LEAKY_SLOPE)
    flops = 2 * N * M * Cin_eff * Cout * taps
    bytes_accessed = (x_eff.size * 2 + w_eff.size * 2 + bias2d.size * 4
                      + N * M * Cout * 2)

    out_flat = pl.pallas_call(
        kernel,
        out_shape=jax.ShapeDtypeStruct((N, M, Cout), jnp.bfloat16),
        grid_spec=pltpu.PrefetchScalarGridSpec(
            num_scalar_prefetch=0,
            grid=(N,),
            in_specs=[
                pl.BlockSpec((1, Hp * Wp, Cin_eff), lambda n: (n, 0, 0)),
                pl.BlockSpec((taps, Cin_eff, Cout), lambda n: (0, 0, 0)),
                pl.BlockSpec((1, Cout), lambda n: (0, 0)),
            ],
            out_specs=pl.BlockSpec((1, M, Cout), lambda n: (n, 0, 0)),
        ),
        compiler_params=pltpu.CompilerParams(
            dimension_semantics=("parallel",),
            vmem_limit_bytes=VMEM_LIMIT_BYTES),
        cost_estimate=pl.CostEstimate(flops=flops, transcendentals=0,
                                      bytes_accessed=bytes_accessed),
    )(x_eff, w_eff, bias2d)

    # Drop the (Wp - OW) junk columns; keep activations bf16 for the next layer.
    return out_flat.reshape(N, OH, Wp, Cout)[:, :, :OW, :]


# ---------------------------------------------------------------------------
# FlowNetS (feature encoder) wrapper
# ---------------------------------------------------------------------------
def init_params(key):
    """Deterministic synthetic weights. PyTorch conv layout (Cout,Cin,KH,KW)."""
    layers = [
        # (Cin, Cout, k, stride, pad)
        (6, 16, 3, 2, 1),
        (16, 32, 3, 2, 1),
        (32, 32, 3, 1, 1),
    ]
    params = []
    for i, (cin, cout, k, s, p) in enumerate(layers):
        kw_key, _ = jax.random.split(jax.random.fold_in(key, i))
        std = 1.0 / np.sqrt(cin * k * k)
        w = std * jax.random.normal(kw_key, (cout, cin, k, k), jnp.float32)
        b = 0.01 * jnp.arange(cout, dtype=jnp.float32)
        params.append((w, b, s, p))
    return params


def flownet_s_forward(x_nchw, params):
    """Input/output follow the PyTorch NCHW convention."""
    x = jnp.transpose(x_nchw, (0, 2, 3, 1)).astype(jnp.bfloat16)   # NCHW -> NHWC
    for (w, b, stride, pad) in params:
        x = conv2d_leaky(x, w, b, stride=stride, padding=pad)
    return jnp.transpose(x, (0, 3, 1, 2)).astype(jnp.float32)      # NHWC -> NCHW


# ---------------------------------------------------------------------------
# Pure-JAX reference (lax conv, same bf16/f32 mixed precision) for correctness
# ---------------------------------------------------------------------------
def _ref_forward(x_nchw, params):
    x = jnp.transpose(x_nchw, (0, 2, 3, 1)).astype(jnp.bfloat16)
    for (w, b, stride, pad) in params:
        w_hwio = jnp.transpose(w, (2, 3, 1, 0)).astype(jnp.bfloat16)
        y = jax.lax.conv_general_dilated(
            x, w_hwio, window_strides=(stride, stride),
            padding=[(pad, pad), (pad, pad)],
            dimension_numbers=("NHWC", "HWIO", "NHWC"),
            preferred_element_type=jnp.float32)
        y = y + b.astype(jnp.float32)
        x = jnp.where(y > 0, y, LEAKY_SLOPE * y).astype(jnp.bfloat16)
    return jnp.transpose(x, (0, 3, 1, 2)).astype(jnp.float32)


if __name__ == "__main__":
    key = jax.random.PRNGKey(0)
    pkey, xkey = jax.random.split(key)

    # FlowNet input: concatenated image pair -> 6 channels, NCHW.
    x = jax.random.normal(xkey, (2, 6, 16, 16), jnp.float32)
    params = init_params(pkey)

    fwd = jax.jit(functools.partial(flownet_s_forward, params=params))
    feature = jax.block_until_ready(fwd(x))

    ref = jax.block_until_ready(_ref_forward(x, params))
    assert feature.shape == (2, 32, 4, 4), feature.shape
    np.testing.assert_allclose(np.asarray(feature), np.asarray(ref),
                               rtol=2e-2, atol=2e-2)
    print("KERNEL_OK")
</pallas_src>

<mosaic_0001>
module attributes {stable_mosaic.version = 11 : i64} {
  func.func @kernel(%arg0: i32, %arg1: memref<1x90x24xbf16, #tpu.memory_space<vmem>>, %arg2: memref<4x24x16xbf16, #tpu.memory_space<vmem>>, %arg3: memref<1x16xf32, #tpu.memory_space<vmem>>, %arg4: memref<1x72x16xbf16, #tpu.memory_space<vmem>>) attributes {dimension_semantics = [#tpu.dimension_semantics<parallel>], iteration_bounds = array<i64: 2>, scalar_prefetch = 0 : i64, scratch_operands = 0 : i64, tpu.core_type = #tpu.core_type<tc>, window_params = [{transform_indices = @transform_0, window_bounds = array<i64: 1, 90, 24>}, {pipeline_mode = #tpu.pipeline_mode<synchronous>, transform_indices = @transform_1, window_bounds = array<i64: 4, 24, 16>}, {pipeline_mode = #tpu.pipeline_mode<synchronous>, transform_indices = @transform_2, window_bounds = array<i64: 1, 16>}, {transform_indices = @transform_3, window_bounds = array<i64: 1, 72, 16>}]} {
    %c0 = arith.constant 0 : index
    %c0_0 = arith.constant 0 : index
    %c0_1 = arith.constant 0 : index
    %0 = vector.load %arg1[%c0, %c0_0, %c0_1] : memref<1x90x24xbf16, #tpu.memory_space<vmem>>, vector<1x72x24xbf16>
    %1 = vector.shape_cast %0 : vector<1x72x24xbf16> to vector<72x24xbf16>
    %c0_2 = arith.constant 0 : index
    %c0_3 = arith.constant 0 : index
    %c0_4 = arith.constant 0 : index
    %2 = vector.load %arg2[%c0_2, %c0_3, %c0_4] : memref<4x24x16xbf16, #tpu.memory_space<vmem>>, vector<1x24x16xbf16>
    %3 = vector.shape_cast %2 : vector<1x24x16xbf16> to vector<24x16xbf16>
    %cst = arith.constant dense<0.000000e+00> : vector<72x16xf32>
    %4 = tpu.matmul %1, %3, %cst {dimension_numbers = #tpu.dot_dimension_numbers<[1], [0], [0], [1], [0, 0, 1, 1], [], []>} : vector<72x24xbf16>, vector<24x16xbf16>, vector<72x16xf32> -> vector<72x16xf32>
    %c0_5 = arith.constant 0 : index
    %c1 = arith.constant 1 : index
    %c0_6 = arith.constant 0 : index
    %5 = vector.load %arg1[%c0_5, %c1, %c0_6] : memref<1x90x24xbf16, #tpu.memory_space<vmem>>, vector<1x72x24xbf16>
    %6 = vector.shape_cast %5 : vector<1x72x24xbf16> to vector<72x24xbf16>
    %c1_7 = arith.constant 1 : index
    %c0_8 = arith.constant 0 : index
    %c0_9 = arith.constant 0 : index
    %7 = vector.load %arg2[%c1_7, %c0_8, %c0_9] : memref<4x24x16xbf16, #tpu.memory_space<vmem>>, vector<1x24x16xbf16>
    %8 = vector.shape_cast %7 : vector<1x24x16xbf16> to vector<24x16xbf16>
    %cst_10 = arith.constant dense<0.000000e+00> : vector<72x16xf32>
    %9 = tpu.matmul %6, %8, %cst_10 {dimension_numbers = #tpu.dot_dimension_numbers<[1], [0], [0], [1], [0, 0, 1, 1], [], []>} : vector<72x24xbf16>, vector<24x16xbf16>, vector<72x16xf32> -> vector<72x16xf32>
    %10 = arith.addf %4, %9 : vector<72x16xf32>
    %c0_11 = arith.constant 0 : index
    %c9 = arith.constant 9 : index
    %c0_12 = arith.constant 0 : index
    %11 = vector.load %arg1[%c0_11, %c9, %c0_12] : memref<1x90x24xbf16, #tpu.memory_space<vmem>>, vector<1x72x24xbf16>
    %12 = vector.shape_cast %11 : vector<1x72x24xbf16> to vector<72x24xbf16>
    %c2 = arith.constant 2 : index
    %c0_13 = arith.constant 0 : index
    %c0_14 = arith.constant 0 : index
    %13 = vector.load %arg2[%c2, %c0_13, %c0_14] : memref<4x24x16xbf16, #tpu.memory_space<vmem>>, vector<1x24x16xbf16>
    %14 = vector.shape_cast %13 : vector<1x24x16xbf16> to vector<24x16xbf16>
    %cst_15 = arith.constant dense<0.000000e+00> : vector<72x16xf32>
    %15 = tpu.matmul %12, %14, %cst_15 {dimension_numbers = #tpu.dot_dimension_numbers<[1], [0], [0], [1], [0, 0, 1, 1], [], []>} : vector<72x24xbf16>, vector<24x16xbf16>, vector<72x16xf32> -> vector<72x16xf32>
    %16 = arith.addf %10, %15 : vector<72x16xf32>
    %c0_16 = arith.constant 0 : index
    %c10 = arith.constant 10 : index
    %c0_17 = arith.constant 0 : index
    %17 = vector.load %arg1[%c0_16, %c10, %c0_17] : memref<1x90x24xbf16, #tpu.memory_space<vmem>>, vector<1x72x24xbf16>
    %18 = vector.shape_cast %17 : vector<1x72x24xbf16> to vector<72x24xbf16>
    %c3 = arith.constant 3 : index
    %c0_18 = arith.constant 0 : index
    %c0_19 = arith.constant 0 : index
    %19 = vector.load %arg2[%c3, %c0_18, %c0_19] : memref<4x24x16xbf16, #tpu.memory_space<vmem>>, vector<1x24x16xbf16>
    %20 = vector.shape_cast %19 : vector<1x24x16xbf16> to vector<24x16xbf16>
    %cst_20 = arith.constant dense<0.000000e+00> : vector<72x16xf32>
    %21 = tpu.matmul %18, %20, %cst_20 {dimension_numbers = #tpu.dot_dimension_numbers<[1], [0], [0], [1], [0, 0, 1, 1], [], []>} : vector<72x24xbf16>, vector<24x16xbf16>, vector<72x16xf32> -> vector<72x16xf32>
    %22 = arith.addf %16, %21 : vector<72x16xf32>
    %c0_21 = arith.constant 0 : index
    %c0_22 = arith.constant 0 : index
    %23 = vector.load %arg3[%c0_21, %c0_22] : memref<1x16xf32, #tpu.memory_space<vmem>>, vector<1x16xf32>
    %24 = vector.broadcast %23 : vector<1x16xf32> to vector<72x16xf32>
    %25 = arith.addf %22, %24 : vector<72x16xf32>
    %cst_23 = arith.constant 0.000000e+00 : f32
    %26 = vector.broadcast %cst_23 : f32 to vector<72x16xf32>
    %27 = arith.cmpf ogt, %25, %26 : vector<72x16xf32>
    %cst_24 = arith.constant 1.000000e-01 : f32
    %28 = vector.broadcast %cst_24 : f32 to vector<72x16xf32>
    %29 = arith.mulf %28, %25 : vector<72x16xf32>
    %30 = arith.select %27, %25, %29 : vector<72x16xi1>, vector<72x16xf32>
    %31 = arith.truncf %30 : vector<72x16xf32> to vector<72x16xbf16>
    %c0_25 = arith.constant 0 : index
    %c0_26 = arith.constant 0 : index
    %c0_27 = arith.constant 0 : index
    %32 = vector.load %arg4[%c0_25, %c0_26, %c0_27] : memref<1x72x16xbf16, #tpu.memory_space<vmem>>, vector<1x72x16xbf16>
    %33 = vector.shape_cast %32 : vector<1x72x16xbf16> to vector<72x16xbf16>
    %34 = vector.shape_cast %31 : vector<72x16xbf16> to vector<1x72x16xbf16>
    tpu.vector_store %arg4[%c0_25, %c0_26, %c0_27], %34 {strides = array<i32>} : memref<1x72x16xbf16, #tpu.memory_space<vmem>>, vector<1x72x16xbf16>,
    return
  }
  func.func @transform_0(%arg0: i32) -> (i32, i32, i32) {
    %c0_i32 = arith.constant 0 : i32
    %c0_i32_0 = arith.constant 0 : i32
    %c0_i32_1 = arith.constant 0 : i32
    return %arg0, %c0_i32, %c0_i32_0 : i32, i32, i32
  }
  func.func @transform_1(%arg0: i32) -> (i32, i32, i32) {
    %c0_i32 = arith.constant 0 : i32
    %c0_i32_0 = arith.constant 0 : i32
    %c0_i32_1 = arith.constant 0 : i32
    %c0_i32_2 = arith.constant 0 : i32
    return %c0_i32, %c0_i32_0, %c0_i32_1 : i32, i32, i32
  }
  func.func @transform_2(%arg0: i32) -> (i32, i32) {
    %c0_i32 = arith.constant 0 : i32
    %c0_i32_0 = arith.constant 0 : i32
    %c0_i32_1 = arith.constant 0 : i32
    return %c0_i32, %c0_i32_0 : i32, i32
  }
  func.func @transform_3(%arg0: i32) -> (i32, i32, i32) {
    %c0_i32 = arith.constant 0 : i32
    %c0_i32_0 = arith.constant 0 : i32
    %c0_i32_1 = arith.constant 0 : i32
    return %arg0, %c0_i32, %c0_i32_0 : i32, i32, i32
  }
}

module attributes {stable_mosaic.version = 11 : i64} {
  func.func @kernel(%arg0: i32, %arg1: memref<1x30x64xbf16, #tpu.memory_space<vmem>>, %arg2: memref<4x64x32xbf16, #tpu.memory_space<vmem>>, %arg3: memref<1x32xf32, #tpu.memory_space<vmem>>, %arg4: memref<1x20x32xbf16, #tpu.memory_space<vmem>>) attributes {dimension_semantics = [#tpu.dimension_semantics<parallel>], iteration_bounds = array<i64: 2>, scalar_prefetch = 0 : i64, scratch_operands = 0 : i64, tpu.core_type = #tpu.core_type<tc>, window_params = [{transform_indices = @transform_0, window_bounds = array<i64: 1, 30, 64>}, {pipeline_mode = #tpu.pipeline_mode<synchronous>, transform_indices = @transform_1, window_bounds = array<i64: 4, 64, 32>}, {pipeline_mode = #tpu.pipeline_mode<synchronous>, transform_indices = @transform_2, window_bounds = array<i64: 1, 32>}, {transform_indices = @transform_3, window_bounds = array<i64: 1, 20, 32>}]} {
    %c0 = arith.constant 0 : index
    %c0_0 = arith.constant 0 : index
    %c0_1 = arith.constant 0 : index
    %0 = vector.load %arg1[%c0, %c0_0, %c0_1] : memref<1x30x64xbf16, #tpu.memory_space<vmem>>, vector<1x20x64xbf16>
    %1 = vector.shape_cast %0 : vector<1x20x64xbf16> to vector<20x64xbf16>
    %c0_2 = arith.constant 0 : index
    %c0_3 = arith.constant 0 : index
    %c0_4 = arith.constant 0 : index
    %2 = vector.load %arg2[%c0_2, %c0_3, %c0_4] : memref<4x64x32xbf16, #tpu.memory_space<vmem>>, vector<1x64x32xbf16>
    %3 = vector.shape_cast %2 : vector<1x64x32xbf16> to vector<64x32xbf16>
    %cst = arith.constant dense<0.000000e+00> : vector<20x32xf32>
    %4 = tpu.matmul %1, %3, %cst {dimension_numbers = #tpu.dot_dimension_numbers<[1], [0], [0], [1], [0, 0, 1, 1], [], []>} : vector<20x64xbf16>, vector<64x32xbf16>, vector<20x32xf32> -> vector<20x32xf32>
    %c0_5 = arith.constant 0 : index
    %c1 = arith.constant 1 : index
    %c0_6 = arith.constant 0 : index
    %5 = vector.load %arg1[%c0_5, %c1, %c0_6] : memref<1x30x64xbf16, #tpu.memory_space<vmem>>, vector<1x20x64xbf16>
    %6 = vector.shape_cast %5 : vector<1x20x64xbf16> to vector<20x64xbf16>
    %c1_7 = arith.constant 1 : index
    %c0_8 = arith.constant 0 : index
    %c0_9 = arith.constant 0 : index
    %7 = vector.load %arg2[%c1_7, %c0_8, %c0_9] : memref<4x64x32xbf16, #tpu.memory_space<vmem>>, vector<1x64x32xbf16>
    %8 = vector.shape_cast %7 : vector<1x64x32xbf16> to vector<64x32xbf16>
    %cst_10 = arith.constant dense<0.000000e+00> : vector<20x32xf32>
    %9 = tpu.matmul %6, %8, %cst_10 {dimension_numbers = #tpu.dot_dimension_numbers<[1], [0], [0], [1], [0, 0, 1, 1], [], []>} : vector<20x64xbf16>, vector<64x32xbf16>, vector<20x32xf32> -> vector<20x32xf32>
    %10 = arith.addf %4, %9 : vector<20x32xf32>
    %c0_11 = arith.constant 0 : index
    %c5 = arith.constant 5 : index
    %c0_12 = arith.constant 0 : index
    %11 = vector.load %arg1[%c0_11, %c5, %c0_12] : memref<1x30x64xbf16, #tpu.memory_space<vmem>>, vector<1x20x64xbf16>
    %12 = vector.shape_cast %11 : vector<1x20x64xbf16> to vector<20x64xbf16>
    %c2 = arith.constant 2 : index
    %c0_13 = arith.constant 0 : index
    %c0_14 = arith.constant 0 : index
    %13 = vector.load %arg2[%c2, %c0_13, %c0_14] : memref<4x64x32xbf16, #tpu.memory_space<vmem>>, vector<1x64x32xbf16>
    %14 = vector.shape_cast %13 : vector<1x64x32xbf16> to vector<64x32xbf16>
    %cst_15 = arith.constant dense<0.000000e+00> : vector<20x32xf32>
    %15 = tpu.matmul %12, %14, %cst_15 {dimension_numbers = #tpu.dot_dimension_numbers<[1], [0], [0], [1], [0, 0, 1, 1], [], []>} : vector<20x64xbf16>, vector<64x32xbf16>, vector<20x32xf32> -> vector<20x32xf32>
    %16 = arith.addf %10, %15 : vector<20x32xf32>
    %c0_16 = arith.constant 0 : index
    %c6 = arith.constant 6 : index
    %c0_17 = arith.constant 0 : index
    %17 = vector.load %arg1[%c0_16, %c6, %c0_17] : memref<1x30x64xbf16, #tpu.memory_space<vmem>>, vector<1x20x64xbf16>
    %18 = vector.shape_cast %17 : vector<1x20x64xbf16> to vector<20x64xbf16>
    %c3 = arith.constant 3 : index
    %c0_18 = arith.constant 0 : index
    %c0_19 = arith.constant 0 : index
    %19 = vector.load %arg2[%c3, %c0_18, %c0_19] : memref<4x64x32xbf16, #tpu.memory_space<vmem>>, vector<1x64x32xbf16>
    %20 = vector.shape_cast %19 : vector<1x64x32xbf16> to vector<64x32xbf16>
    %cst_20 = arith.constant dense<0.000000e+00> : vector<20x32xf32>
    %21 = tpu.matmul %18, %20, %cst_20 {dimension_numbers = #tpu.dot_dimension_numbers<[1], [0], [0], [1], [0, 0, 1, 1], [], []>} : vector<20x64xbf16>, vector<64x32xbf16>, vector<20x32xf32> -> vector<20x32xf32>
    %22 = arith.addf %16, %21 : vector<20x32xf32>
    %c0_21 = arith.constant 0 : index
    %c0_22 = arith.constant 0 : index
    %23 = vector.load %arg3[%c0_21, %c0_22] : memref<1x32xf32, #tpu.memory_space<vmem>>, vector<1x32xf32>
    %24 = vector.broadcast %23 : vector<1x32xf32> to vector<20x32xf32>
    %25 = arith.addf %22, %24 : vector<20x32xf32>
    %cst_23 = arith.constant 0.000000e+00 : f32
    %26 = vector.broadcast %cst_23 : f32 to vector<20x32xf32>
    %27 = arith.cmpf ogt, %25, %26 : vector<20x32xf32>
    %cst_24 = arith.constant 1.000000e-01 : f32
    %28 = vector.broadcast %cst_24 : f32 to vector<20x32xf32>
    %29 = arith.mulf %28, %25 : vector<20x32xf32>
    %30 = arith.select %27, %25, %29 : vector<20x32xi1>, vector<20x32xf32>
    %31 = arith.truncf %30 : vector<20x32xf32> to vector<20x32xbf16>
    %c0_25 = arith.constant 0 : index
    %c0_26 = arith.constant 0 : index
    %c0_27 = arith.constant 0 : index
    %32 = vector.load %arg4[%c0_25, %c0_26, %c0_27] : memref<1x20x32xbf16, #tpu.memory_space<vmem>>, vector<1x20x32xbf16>
    %33 = vector.shape_cast %32 : vector<1x20x32xbf16> to vector<20x32xbf16>
    %34 = vector.shape_cast %31 : vector<20x32xbf16> to vector<1x20x32xbf16>
    tpu.vector_store %arg4[%c0_25, %c0_26, %c0_27], %34 {strides = array<i32>} : memref<1x20x32xbf16, #tpu.memory_space<vmem>>, vector<1x20x32xbf16>,
    return
  }
  func.func @transform_0(%arg0: i32) -> (i32, i32, i32) {
    %c0_i32 = arith.constant 0 : i32
    %c0_i32_0 = arith.constant 0 : i32
    %c0_i32_1 = arith.constant 0 : i32
    return %arg0, %c0_i32, %c0_i32_0 : i32, i32, i32
  }
  func.func @transform_1(%arg0: i32) -> (i32, i32, i32) {
    %c0_i32 = arith.constant 0 : i32
    %c0_i32_0 = arith.constant 0 : i32
    %c0_i32_1 = arith.constant 0 : i32
    %c0_i32_2 = arith.constant 0 : i32
    return %c0_i32, %c0_i32_0, %c0_i32_1 : i32, i32, i32
  }
  func.func @transform_2(%arg0: i32) -> (i32, i32) {
    %c0_i32 = arith.constant 0 : i32
    %c0_i32_0 = arith.constant 0 : i32
    %c0_i32_1 = arith.constant 0 : i32
    return %c0_i32, %c0_i32_0 : i32, i32
  }
  func.func @transform_3(%arg0: i32) -> (i32, i32, i32) {
    %c0_i32 = arith.constant 0 : i32
    %c0_i32_0 = arith.constant 0 : i32
    %c0_i32_1 = arith.constant 0 : i32
    return %arg0, %c0_i32, %c0_i32_0 : i32, i32, i32
  }
}

module attributes {stable_mosaic.version = 11 : i64} {
  func.func @kernel(%arg0: i32, %arg1: memref<1x42x32xbf16, #tpu.memory_space<vmem>>, %arg2: memref<9x32x32xbf16, #tpu.memory_space<vmem>>, %arg3: memref<1x32xf32, #tpu.memory_space<vmem>>, %arg4: memref<1x24x32xbf16, #tpu.memory_space<vmem>>) attributes {dimension_semantics = [#tpu.dimension_semantics<parallel>], iteration_bounds = array<i64: 2>, scalar_prefetch = 0 : i64, scratch_operands = 0 : i64, tpu.core_type = #tpu.core_type<tc>, window_params = [{transform_indices = @transform_0, window_bounds = array<i64: 1, 42, 32>}, {pipeline_mode = #tpu.pipeline_mode<synchronous>, transform_indices = @transform_1, window_bounds = array<i64: 9, 32, 32>}, {pipeline_mode = #tpu.pipeline_mode<synchronous>, transform_indices = @transform_2, window_bounds = array<i64: 1, 32>}, {transform_indices = @transform_3, window_bounds = array<i64: 1, 24, 32>}]} {
    %c0 = arith.constant 0 : index
    %c0_0 = arith.constant 0 : index
    %c0_1 = arith.constant 0 : index
    %0 = vector.load %arg1[%c0, %c0_0, %c0_1] : memref<1x42x32xbf16, #tpu.memory_space<vmem>>, vector<1x24x32xbf16>
    %1 = vector.shape_cast %0 : vector<1x24x32xbf16> to vector<24x32xbf16>
    %c0_2 = arith.constant 0 : index
    %c0_3 = arith.constant 0 : index
    %c0_4 = arith.constant 0 : index
    %2 = vector.load %arg2[%c0_2, %c0_3, %c0_4] : memref<9x32x32xbf16, #tpu.memory_space<vmem>>, vector<1x32x32xbf16>
    %3 = vector.shape_cast %2 : vector<1x32x32xbf16> to vector<32x32xbf16>
    %cst = arith.constant dense<0.000000e+00> : vector<24x32xf32>
    %4 = tpu.matmul %1, %3, %cst {dimension_numbers = #tpu.dot_dimension_numbers<[1], [0], [0], [1], [0, 0, 1, 1], [], []>} : vector<24x32xbf16>, vector<32x32xbf16>, vector<24x32xf32> -> vector<24x32xf32>
    %c0_5 = arith.constant 0 : index
    %c1 = arith.constant 1 : index
    %c0_6 = arith.constant 0 : index
    %5 = vector.load %arg1[%c0_5, %c1, %c0_6] : memref<1x42x32xbf16, #tpu.memory_space<vmem>>, vector<1x24x32xbf16>
    %6 = vector.shape_cast %5 : vector<1x24x32xbf16> to vector<24x32xbf16>
    %c1_7 = arith.constant 1 : index
    %c0_8 = arith.constant 0 : index
    %c0_9 = arith.constant 0 : index
    %7 = vector.load %arg2[%c1_7, %c0_8, %c0_9] : memref<9x32x32xbf16, #tpu.memory_space<vmem>>, vector<1x32x32xbf16>
    %8 = vector.shape_cast %7 : vector<1x32x32xbf16> to vector<32x32xbf16>
    %cst_10 = arith.constant dense<0.000000e+00> : vector<24x32xf32>
    %9 = tpu.matmul %6, %8, %cst_10 {dimension_numbers = #tpu.dot_dimension_numbers<[1], [0], [0], [1], [0, 0, 1, 1], [], []>} : vector<24x32xbf16>, vector<32x32xbf16>, vector<24x32xf32> -> vector<24x32xf32>
    %10 = arith.addf %4, %9 : vector<24x32xf32>
    %c0_11 = arith.constant 0 : index
    %c2 = arith.constant 2 : index
    %c0_12 = arith.constant 0 : index
    %11 = vector.load %arg1[%c0_11, %c2, %c0_12] : memref<1x42x32xbf16, #tpu.memory_space<vmem>>, vector<1x24x32xbf16>
    %12 = vector.shape_cast %11 : vector<1x24x32xbf16> to vector<24x32xbf16>
    %c2_13 = arith.constant 2 : index
    %c0_14 = arith.constant 0 : index
    %c0_15 = arith.constant 0 : index
    %13 = vector.load %arg2[%c2_13, %c0_14, %c0_15] : memref<9x32x32xbf16, #tpu.memory_space<vmem>>, vector<1x32x32xbf16>
    %14 = vector.shape_cast %13 : vector<1x32x32xbf16> to vector<32x32xbf16>
    %cst_16 = arith.constant dense<0.000000e+00> : vector<24x32xf32>
    %15 = tpu.matmul %12, %14, %cst_16 {dimension_numbers = #tpu.dot_dimension_numbers<[1], [0], [0], [1], [0, 0, 1, 1], [], []>} : vector<24x32xbf16>, vector<32x32xbf16>, vector<24x32xf32> -> vector<24x32xf32>
    %16 = arith.addf %10, %15 : vector<24x32xf32>
    %c0_17 = arith.constant 0 : index
    %c6 = arith.constant 6 : index
    %c0_18 = arith.constant 0 : index
    %17 = vector.load %arg1[%c0_17, %c6, %c0_18] : memref<1x42x32xbf16, #tpu.memory_space<vmem>>, vector<1x24x32xbf16>
    %18 = vector.shape_cast %17 : vector<1x24x32xbf16> to vector<24x32xbf16>
    %c3 = arith.constant 3 : index
    %c0_19 = arith.constant 0 : index
    %c0_20 = arith.constant 0 : index
    %19 = vector.load %arg2[%c3, %c0_19, %c0_20] : memref<9x32x32xbf16, #tpu.memory_space<vmem>>, vector<1x32x32xbf16>
    %20 = vector.shape_cast %19 : vector<1x32x32xbf16> to vector<32x32xbf16>
    %cst_21 = arith.constant dense<0.000000e+00> : vector<24x32xf32>
    %21 = tpu.matmul %18, %20, %cst_21 {dimension_numbers = #tpu.dot_dimension_numbers<[1], [0], [0], [1], [0, 0, 1, 1], [], []>} : vector<24x32xbf16>, vector<32x32xbf16>, vector<24x32xf32> -> vector<24x32xf32>
    %22 = arith.addf %16, %21 : vector<24x32xf32>
    %c0_22 = arith.constant 0 : index
    %c7 = arith.constant 7 : index
    %c0_23 = arith.constant 0 : index
    %23 = vector.load %arg1[%c0_22, %c7, %c0_23] : memref<1x42x32xbf16, #tpu.memory_space<vmem>>, vector<1x24x32xbf16>
    %24 = vector.shape_cast %23 : vector<1x24x32xbf16> to vector<24x32xbf16>
    %c4 = arith.constant 4 : index
    %c0_24 = arith.constant 0 : index
    %c0_25 = arith.constant 0 : index
    %25 = vector.load %arg2[%c4, %c0_24, %c0_25] : memref<9x32x32xbf16, #tpu.memory_space<vmem>>, vector<1x32x32xbf16>
    %26 = vector.shape_cast %25 : vector<1x32x32xbf16> to vector<32x32xbf16>
    %cst_26 = arith.constant dense<0.000000e+00> : vector<24x32xf32>
    %27 = tpu.matmul %24, %26, %cst_26 {dimension_numbers = #tpu.dot_dimension_numbers<[1], [0], [0], [1], [0, 0, 1, 1], [], []>} : vector<24x32xbf16>, vector<32x32xbf16>, vector<24x32xf32> -> vector<24x32xf32>
    %28 = arith.addf %22, %27 : vector<24x32xf32>
    %c0_27 = arith.constant 0 : index
    %c8 = arith.constant 8 : index
    %c0_28 = arith.constant 0 : index
    %29 = vector.load %arg1[%c0_27, %c8, %c0_28] : memref<1x42x32xbf16, #tpu.memory_space<vmem>>, vector<1x24x32xbf16>
    %30 = vector.shape_cast %29 : vector<1x24x32xbf16> to vector<24x32xbf16>
    %c5 = arith.constant 5 : index
    %c0_29 = arith.constant 0 : index
    %c0_30 = arith.constant 0 : index
    %31 = vector.load %arg2[%c5, %c0_29, %c0_30] : memref<9x32x32xbf16, #tpu.memory_space<vmem>>, vector<1x32x32xbf16>
    %32 = vector.shape_cast %31 : vector<1x32x32xbf16> to vector<32x32xbf16>
    %cst_31 = arith.constant dense<0.000000e+00> : vector<24x32xf32>
    %33 = tpu.matmul %30, %32, %cst_31 {dimension_numbers = #tpu.dot_dimension_numbers<[1], [0], [0], [1], [0, 0, 1, 1], [], []>} : vector<24x32xbf16>, vector<32x32xbf16>, vector<24x32xf32> -> vector<24x32xf32>
    %34 = arith.addf %28, %33 : vector<24x32xf32>
    %c0_32 = arith.constant 0 : index
    %c12 = arith.constant 12 : index
    %c0_33 = arith.constant 0 : index
    %35 = vector.load %arg1[%c0_32, %c12, %c0_33] : memref<1x42x32xbf16, #tpu.memory_space<vmem>>, vector<1x24x32xbf16>
    %36 = vector.shape_cast %35 : vector<1x24x32xbf16> to vector<24x32xbf16>
    %c6_34 = arith.constant 6 : index
    %c0_35 = arith.constant 0 : index
    %c0_36 = arith.constant 0 : index
    %37 = vector.load %arg2[%c6_34, %c0_35, %c0_36] : memref<9x32x32xbf16, #tpu.memory_space<vmem>>, vector<1x32x32xbf16>
    %38 = vector.shape_cast %37 : vector<1x32x32xbf16> to vector<32x32xbf16>
    %cst_37 = arith.constant dense<0.000000e+00> : vector<24x32xf32>
    %39 = tpu.matmul %36, %38, %cst_37 {dimension_numbers = #tpu.dot_dimension_numbers<[1], [0], [0], [1], [0, 0, 1, 1], [], []>} : vector<24x32xbf16>, vector<32x32xbf16>, vector<24x32xf32> -> vector<24x32xf32>
    %40 = arith.addf %34, %39 : vector<24x32xf32>
    %c0_38 = arith.constant 0 : index
    %c13 = arith.constant 13 : index
    %c0_39 = arith.constant 0 : index
    %41 = vector.load %arg1[%c0_38, %c13, %c0_39] : memref<1x42x32xbf16, #tpu.memory_space<vmem>>, vector<1x24x32xbf16>
    %42 = vector.shape_cast %41 : vector<1x24x32xbf16> to vector<24x32xbf16>
    %c7_40 = arith.constant 7 : index
    %c0_41 = arith.constant 0 : index
    %c0_42 = arith.constant 0 : index
    %43 = vector.load %arg2[%c7_40, %c0_41, %c0_42] : memref<9x32x32xbf16, #tpu.memory_space<vmem>>, vector<1x32x32xbf16>
    %44 = vector.shape_cast %43 : vector<1x32x32xbf16> to vector<32x32xbf16>
    %cst_43 = arith.constant dense<0.000000e+00> : vector<24x32xf32>
    %45 = tpu.matmul %42, %44, %cst_43 {dimension_numbers = #tpu.dot_dimension_numbers<[1], [0], [0], [1], [0, 0, 1, 1], [], []>} : vector<24x32xbf16>, vector<32x32xbf16>, vector<24x32xf32> -> vector<24x32xf32>
    %46 = arith.addf %40, %45 : vector<24x32xf32>
    %c0_44 = arith.constant 0 : index
    %c14 = arith.constant 14 : index
    %c0_45 = arith.constant 0 : index
    %47 = vector.load %arg1[%c0_44, %c14, %c0_45] : memref<1x42x32xbf16, #tpu.memory_space<vmem>>, vector<1x24x32xbf16>
    %48 = vector.shape_cast %47 : vector<1x24x32xbf16> to vector<24x32xbf16>
    %c8_46 = arith.constant 8 : index
    %c0_47 = arith.constant 0 : index
    %c0_48 = arith.constant 0 : index
    %49 = vector.load %arg2[%c8_46, %c0_47, %c0_48] : memref<9x32x32xbf16, #tpu.memory_space<vmem>>, vector<1x32x32xbf16>
    %50 = vector.shape_cast %49 : vector<1x32x32xbf16> to vector<32x32xbf16>
    %cst_49 = arith.constant dense<0.000000e+00> : vector<24x32xf32>
    %51 = tpu.matmul %48, %50, %cst_49 {dimension_numbers = #tpu.dot_dimension_numbers<[1], [0], [0], [1], [0, 0, 1, 1], [], []>} : vector<24x32xbf16>, vector<32x32xbf16>, vector<24x32xf32> -> vector<24x32xf32>
    %52 = arith.addf %46, %51 : vector<24x32xf32>
    %c0_50 = arith.constant 0 : index
    %c0_51 = arith.constant 0 : index
    %53 = vector.load %arg3[%c0_50, %c0_51] : memref<1x32xf32, #tpu.memory_space<vmem>>, vector<1x32xf32>
    %54 = vector.broadcast %53 : vector<1x32xf32> to vector<24x32xf32>
    %55 = arith.addf %52, %54 : vector<24x32xf32>
    %cst_52 = arith.constant 0.000000e+00 : f32
    %56 = vector.broadcast %cst_52 : f32 to vector<24x32xf32>
    %57 = arith.cmpf ogt, %55, %56 : vector<24x32xf32>
    %cst_53 = arith.constant 1.000000e-01 : f32
    %58 = vector.broadcast %cst_53 : f32 to vector<24x32xf32>
    %59 = arith.mulf %58, %55 : vector<24x32xf32>
    %60 = arith.select %57, %55, %59 : vector<24x32xi1>, vector<24x32xf32>
    %61 = arith.truncf %60 : vector<24x32xf32> to vector<24x32xbf16>
    %c0_54 = arith.constant 0 : index
    %c0_55 = arith.constant 0 : index
    %c0_56 = arith.constant 0 : index
    %62 = vector.load %arg4[%c0_54, %c0_55, %c0_56] : memref<1x24x32xbf16, #tpu.memory_space<vmem>>, vector<1x24x32xbf16>
    %63 = vector.shape_cast %62 : vector<1x24x32xbf16> to vector<24x32xbf16>
    %64 = vector.shape_cast %61 : vector<24x32xbf16> to vector<1x24x32xbf16>
    tpu.vector_store %arg4[%c0_54, %c0_55, %c0_56], %64 {strides = array<i32>} : memref<1x24x32xbf16, #tpu.memory_space<vmem>>, vector<1x24x32xbf16>,
    return
  }
  func.func @transform_0(%arg0: i32) -> (i32, i32, i32) {
    %c0_i32 = arith.constant 0 : i32
    %c0_i32_0 = arith.constant 0 : i32
    %c0_i32_1 = arith.constant 0 : i32
    return %arg0, %c0_i32, %c0_i32_0 : i32, i32, i32
  }
  func.func @transform_1(%arg0: i32) -> (i32, i32, i32) {
    %c0_i32 = arith.constant 0 : i32
    %c0_i32_0 = arith.constant 0 : i32
    %c0_i32_1 = arith.constant 0 : i32
    %c0_i32_2 = arith.constant 0 : i32
    return %c0_i32, %c0_i32_0, %c0_i32_1 : i32, i32, i32
  }
  func.func @transform_2(%arg0: i32) -> (i32, i32) {
    %c0_i32 = arith.constant 0 : i32
    %c0_i32_0 = arith.constant 0 : i32
    %c0_i32_1 = arith.constant 0 : i32
    return %c0_i32, %c0_i32_0 : i32, i32
  }
  func.func @transform_3(%arg0: i32) -> (i32, i32, i32) {
    %c0_i32 = arith.constant 0 : i32
    %c0_i32_0 = arith.constant 0 : i32
    %c0_i32_1 = arith.constant 0 : i32
    return %arg0, %c0_i32, %c0_i32_0 : i32, i32, i32
  }
}

</mosaic_0001>

<bundles_post_ra>
// kernel: flownet_s_forward.3
= control target key start
LH: loop header
LB: loop body
LE: loop exit
PB: predicated region body
PF: predicated region fallthrough
CT: control target
= control target key end

     0   :  { %s1171_s12 = smov 0   ;;  %s1382_s0 = inlined_call_operand.vmem [shape: bf16[2,90,24], index: 0, kind: input, shape index: {}]   ;;  %s1383_s1 = inlined_call_operand.vmem [shape: bf16[4,24,16], index: 1, kind: input, shape index: {}]   ;;  %s1384_s2 = inlined_call_operand.vmem [shape: f32[1,16], index: 2, kind: input, shape index: {}]   ;;  %s1385_s3 = inlined_call_operand.vmem [shape: bf16[2,72,16], index: 3, kind: output, shape index: {}]  }
   0x1 LB: > { %s908_s13 = sadd.s32 4294967295, %s1147_s12   ;;  %p912_p0 = scmp.ge.s32.totalorder %s1147_s12, 1  ;;  %s1147_s12 = sphi %s1171_s12, %s13_s12  }
   0x2   : > { %p137_p1 = scmp.lt.s32.totalorder %s1147_s12, 3 }
   0x4   : > { %p138_p2 = pnand %p912_p0, %p137_p1 }
   0x5   : > { %p161_p3 = scmp.lt.s32.totalorder (!%p138_p2), %s908_s13, 1 }
   0x6   : > { %141 = sbr.rel (%p138_p2) target bundleno = 301 (0x12d), region = 32 }
   0xb   : > { %vm279_vm0 = vcmask 1043456   ;;  %v1121_v0 = vld [vmem:[%s1383_s1 + $0x8] ss:$0 sps:$4 sm:$0xff]   ;;  %v1149_v1 = vmov 0.0   ;;  %v1122_v2 = vld [vmem:[%s1383_s1 + $0x14] ss:$0 sps:$4 sm:$0xff]  }
   0xc   : > { %1037 = vmatprep.subr.bf16.mxu1 %v1149_v1  ;;  %1013 = vmatprep.subr.bf16.mxu0 %v1149_v1  ;;  %v377_v3 = vsel %vm279_vm0, %v1121_v0, 0  ;;  %v1123_v4 = vld [vmem:[%s1383_s1] sm:$0xff]   ;;  %v281_v5 = vsel %vm279_vm0, %v1122_v2, 0  ;;  %vm1150_vm1 = vmmov 0   ;;  %v1124_v6 = vld [vmem:[%s1383_s1 + $0xc] sm:$0xff]   ;;  %s1387_s13 = smov (!%p161_p3, %s908_s13), 1 }
   0xd   : > { %1038 = vmatpush3.bf16.msra.mxu1 %v377_v3  ;;  %1041 = vmatprep.mubr.msk.bf16.mxu1 %vm1150_vm1, %v1149_v1  ;;  %v1128_v7 = vld [vmem:[%s1383_s1 + $0x2c] ss:$0 sps:$4 sm:$0xff]   ;;  %s1109_s24 = smul.u32 48, %s1387_s13  ;;  %vm263_vm2 = vcmask 195584   ;;  %v1127_v11 = vld [vmem:[%s1383_s1 + $0x20] ss:$0 sps:$4 sm:$0xff]  }
   0xe   : > { %1014 = vmatpush3.bf16.msra.mxu0 %v281_v5  ;;  %1039 = vmatprep.subr.bf16.mxu1 %v1149_v1  ;;  %v680_v9 = vsel %vm279_vm0, %v1128_v7, 0  ;;  %v1132_v16 = vld [vmem:[%s1383_s1 + $0x24] sm:$0xff]   ;;  %vm214_vm3 = vsmask.f32 7424  ;;  %v554_v22 = vsel %vm279_vm0, %v1127_v11, 0  ;;  %v1131_v27 = vld [vmem:[%s1383_s1 + $0x18] sm:$0xff]  }
   0xf   : > { %1015 = vmatprep.subr.bf16.mxu0 %v1149_v1  ;;  %1017 = vmatprep.mubr.msk.bf16.mxu0 %vm1150_vm1, %v1149_v1  ;;  %s1211_s27 = scalar_lea.vmem %s1382_s0, %s1109_s24  ;;  %vm645_vm4 = vcmask 1046528   ;;  %s1110_s9 = smul.u32 36, %s1387_s13  ;;  %vm843_vm6 = vcmask 125952  }
  0x10   : > { %v1125_v8 = vld [vmem:[%s1211_s27] sm:$0xff]   ;;  %v1126_v10 = vld [vmem:[%s1211_s27 + $0x8] sm:$0xff]   ;;  %v1129_v15 = vld [vmem:[%s1211_s27 + $0x10] sm:$0xff]  }
  0x11   : > { %1040 = vmatpush3.bf16.msra.mxu1 %v1123_v4  ;;  %v216_v12 = vshrl.u32 %v1125_v8, 16  ;;  %v218_v13 = vshll.u32 %v1125_v8, 16  ;;  %v223_v14 = vshll.u32 %v1126_v10, 16  ;;  %v227_v20 = vshrl.u32 %v1126_v10, 16  ;;  %v1130_v26 = vld [vmem:[%s1211_s27 + $0x18] sm:$0xff]   ;;  %v1136_v47 = vld [vmem:[%s1211_s27 + $0xc] sm:$0xff]   ;;  %s1340_s14 = scalar_lea.vmem %s1385_s3, %s1110_s9 }
  0x12   : > { %1016 = vmatpush3.bf16.msra.mxu0 %v1124_v6  ;;  %1085 = vmatprep.subr.bf16.mxu1 %v1149_v1  ;;  %v231_v21 = vshll.u32 %v1129_v15, 16  ;;  %v235_v29 = vshrl.u32 %v1129_v15, 16  ;;  %v239_v30 = vshll.u32 %v1130_v26, 16  ;;  %v180_v31 = vld [vmem:[%s1211_s27 + $0x20] sm:$0xf]  ;;  %v243_v37 = vshrl.u32 %v1130_v26, 16 }
  0x13   : > { %1061 = vmatprep.subr.bf16.mxu0 %v1149_v1  ;;  %v220_v17 = vrot.slane %v218_v13, 1  ;;  %v225_v18 = vrot.slane %v223_v14, 1  ;;  %v184_v32 = vld [vmem:[%s1211_s27 + $0x24] sm:$0x1]  ;;  %v452_v42 = vld [vmem:[%s1211_s27 + $0x8] sm:$0xf]  ;;  %v930_v45 = vcombine.low %v180_v31, %v180_v31 }
  0x14   : > { %1042 = vmatmul.mubr.msk.bf16.vlgmr.msra.gmra.mxu1 %vm263_vm2, %v1125_v8  ;;  %v233_v25 = vrot.slane %v231_v21, 1  ;;  %v241_v34 = vrot.slane %v239_v30, 1  ;;  %v922_v35 = vcombine.low %v180_v31, %v184_v32  ;;  %v451_v41 = vld [vmem:[%s1211_s27 + $0x4] sm:$0xf]  ;;  %v647_v52 = vrot.slane %v1136_v47, 1  ;;  %v1138_v58 = vld [vmem:[%s1211_s27 + $0x14] sm:$0xff]  }
  0x15   : > { %1086 = vmatpush3.bf16.msra.mxu1 %v680_v9  ;;  %1045 = vmatprep.mubr.msk.bf16.mxu1 %vm1150_vm1, %v1149_v1  ;;  %v221_v19 = vor.u32 %v220_v17, %v216_v12  ;;  %v229_v24 = vor.u32 %v227_v20, %v225_v18  ;;  %v637_v43 = vld [vmem:[%s1211_s27 + $0x4] sm:$0xe]  ;;  %v941_v46 = vcombine.low %v451_v41, %v452_v42  ;;  %v498_v56 = vshll.u32 %v1136_v47, 16  ;;  %v1139_v3 = vld [vmem:[%s1211_s27 + $0x1c] sm:$0xff]  }
  0x16   : > { %1087 = vmatprep.subr.bf16.mxu1 %v1149_v1  ;;  %v237_v33 = vor.u32 %v235_v29, %v233_v25  ;;  %v247_v38 = vshll.u32 %v922_v35, 16  ;;  %v245_v39 = vor.u32 %v243_v37, %v241_v34  ;;  %v956_v48 = vcombine.low %v637_v43, %v452_v42  ;;  %v1140_v11 = vld [vmem:[%s1211_s27 + $0x24] sm:$0x1f]  }
  0x17   : > { %v226_v23 = vsel %vm214_vm3, %v221_v19, %v225_v18  ;;  %v234_v28 = vsel %vm214_vm3, %v229_v24, %v233_v25  ;;  %v251_v49 = vshrl.u32 %v922_v35, 16  ;;  %v493_v50 = vshll.u32 %v941_v46, 16 }
  0x18   : > { %1018 = vmatmul.mubr.msk.bf16.vlgmr.msra.gmra.mxu0 %vm263_vm2, %v226_v23  ;;  %v242_v36 = vsel %vm214_vm3, %v237_v33, %v241_v34  ;;  %v249_v40 = vrot.slane %v247_v38, 1  ;;  %v646_v51 = vrot.slane %v956_v48, 1  ;;  %v491_v54 = vshrl.u32 %v941_v46, 16 }
  0x19   : > { %1088 = vmatpush3.bf16.msra.mxu1 %v1132_v16  ;;  %1062 = vmatpush3.bf16.msra.mxu0 %v554_v22  ;;  %v495_v55 = vrot.slane %v493_v50, 1  ;;  %v500_v60 = vrot.slane %v498_v56, 1  ;;  %v649_v61 = vrot.slane %v1138_v58, 1  ;;  %v502_v63 = vshrl.u32 %v1136_v47, 16 }
  0x1a   : > { %1021 = vmatprep.mubr.msk.bf16.mxu0 %vm1150_vm1, %v1149_v1  ;;  %1063 = vmatprep.subr.bf16.mxu0 %v1149_v1  ;;  %v250_v44 = vsel %vm214_vm3, %v245_v39, %v249_v40  ;;  %v253_v53 = vor.u32 %v251_v49, %v249_v40  ;;  %v648_v57 = vsel %vm645_vm4, %v646_v51, %v647_v52  ;;  %v506_v0 = vshll.u32 %v1138_v58, 16 }
  0x1b   : > { %v496_v59 = vor.u32 %v495_v55, %v491_v54  ;;  %v650_v2 = vsel %vm645_vm4, %v647_v52, %v649_v61  ;;  %v504_v4 = vor.u32 %v502_v63, %v500_v60  ;;  %v651_v6 = vrot.slane %v1139_v3, 1 }
  0x1c   : > { %1046 = vmatmul.mubr.msk.bf16.gmra.mxu1 %vm263_vm2, %v1126_v10  ;;  %v508_v5 = vrot.slane %v506_v0, 1  ;;  %v510_v8 = vshrl.u32 %v1138_v58, 16  ;;  %v514_v9 = vshll.u32 %v1139_v3, 16  ;;  %v653_v14 = vrot.slane %v1140_v11, 1 }
  0x1d   : > { %1049 = vmatprep.mubr.msk.bf16.mxu1 %vm1150_vm1, %v1149_v1  ;;  %1064 = vmatpush3.bf16.msra.mxu0 %v1131_v27  ;;  %v501_v62 = vsel %vm214_vm3, %v496_v59, %v500_v60  ;;  %v652_v10 = vsel %vm645_vm4, %v649_v61, %v651_v6  ;;  %v518_v16 = vshrl.u32 %v1139_v3, 16  ;;  %v522_v17 = vshll.u32 %v1140_v11, 16 }
  0x1e   : > { %v509_v7 = vsel %vm214_vm3, %v504_v4, %v508_v5  ;;  %v512_v12 = vor.u32 %v510_v8, %v508_v5  ;;  %v516_v13 = vrot.slane %v514_v9, 1  ;;  %v654_v18 = vsel %vm645_vm4, %v651_v6, %v653_v14  ;;  %v1333_v8 = vld [vmem:[%s1384_s2] ss:$0 sm:$0xff] }
  0x1f   : > { %v524_v20 = vrot.slane %v522_v17, 1  ;;  %v526_v22 = vshrl.u32 %v1140_v11, 16 }
  0x20   : > { %1022 = vmatmul.mubr.msk.bf16.gmra.mxu0 %vm263_vm2, %v234_v28  ;;  %v520_v19 = vor.u32 %v518_v16, %v516_v13 }
  0x21   : > { %1025 = vmatprep.mubr.msk.bf16.mxu0 %vm1150_vm1, %v1149_v1  ;;  %v528_v23 = vor.u32 %v526_v22, %v524_v20 }
  0x22   : > { %v525_v21 = vsel %vm214_vm3, %v520_v19, %v524_v20 }
  0x24   : > { %1050 = vmatmul.mubr.msk.bf16.gmra.mxu1 %vm263_vm2, %v1129_v15  ;;  %v517_v15 = vsel %vm214_vm3, %v512_v12, %v516_v13 }
  0x25   : > { %1053 = vmatprep.mubr.msk.bf16.mxu1 %vm1150_vm1, %v1149_v1 }
  0x28   : > { %1026 = vmatmul.mubr.msk.bf16.gmra.mxu0 %vm263_vm2, %v242_v36 }
  0x29   : > { %1029 = vmatprep.mubr.msk.bf16.mxu0 %vm1150_vm1, %v1149_v1 }
  0x2c   : > { %1054 = vmatmul.mubr.msk.bf16.gmra.mxu1 %vm263_vm2, %v1130_v26 }
  0x2d   : > { %1057 = vmatprep.mubr.msk.bf16.mxu1 %vm1150_vm1, %v1149_v1 }
  0x30   : > { %1030 = vmatmul.mubr.msk.bf16.gmra.mxu0 %vm263_vm2, %v250_v44 }
  0x31   : > { %1033 = vmatprep.mubr.msk.bf16.mxu0 %vm1150_vm1, %v1149_v1 }
  0x34   : > { %1058 = vmatmul.mubr.msk.bf16.gmra.mxu1 %vm263_vm2, %v930_v45 }
  0x35   : > { %1089 = vmatprep.mubr.msk.bf16.mxu1 %vm1150_vm1, %v1149_v1 }
  0x38   : > { %1034 = vmatmul.mubr.msk.bf16.gmra.mxu0 %vm263_vm2, %v253_v53 }
  0x39   : > { %1065 = vmatprep.mubr.msk.bf16.mxu0 %vm1150_vm1, %v1149_v1 }
  0x3c   : > { %1090 = vmatmul.mubr.msk.bf16.vlgmr.msra.gmra.mxu1 %vm263_vm2, %v648_v57 }
  0x3d   : > { %1093 = vmatprep.mubr.msk.bf16.mxu1 %vm1150_vm1, %v1149_v1 }
  0x40   : > { %1066 = vmatmul.mubr.msk.bf16.vlgmr.msra.gmra.mxu0 %vm263_vm2, %v501_v62 }
  0x41   : > { %1069 = vmatprep.mubr.msk.bf16.mxu0 %vm1150_vm1, %v1149_v1 }
  0x44   : > { %1094 = vmatmul.mubr.msk.bf16.gmra.mxu1 %vm263_vm2, %v650_v2 }
  0x45   : > { %1097 = vmatprep.mubr.msk.bf16.mxu1 %vm1150_vm1, %v1149_v1 }
  0x48   : > { %1070 = vmatmul.mubr.msk.bf16.gmra.mxu0 %vm263_vm2, %v509_v7 }
  0x49   : > { %1073 = vmatprep.mubr.msk.bf16.mxu0 %vm1150_vm1, %v1149_v1 }
  0x4c   : > { %1098 = vmatmul.mubr.msk.bf16.gmra.mxu1 %vm263_vm2, %v652_v10 }
  0x4d   : > { %1101 = vmatprep.mubr.msk.bf16.mxu1 %vm1150_vm1, %v1149_v1 }
  0x50   : > { %1074 = vmatmul.mubr.msk.bf16.gmra.mxu0 %vm263_vm2, %v517_v15 }
  0x51   : > { %1077 = vmatprep.mubr.msk.bf16.mxu0 %vm1150_vm1, %v1149_v1 }
  0x54   : > { %1102 = vmatmul.mubr.msk.bf16.gmra.mxu1 %vm263_vm2, %v654_v18 }
  0x55   : > { %1105 = vmatprep.mubr.msk.bf16.mxu1 %vm1150_vm1, %v1149_v1 }
  0x58   : > { %1078 = vmatmul.mubr.msk.bf16.gmra.mxu0 %vm263_vm2, %v525_v21 }
  0x59   : > { %1081 = vmatprep.mubr.msk.bf16.mxu0 %vm1150_vm1, %v1149_v1 }
  0x5c   : > { %1106 = vmatmul.mubr.msk.bf16.gmra.mxu1 %vm263_vm2, %v653_v14 }
  0x60   : > { %1082 = vmatmul.mubr.msk.bf16.gmra.mxu0 %vm263_vm2, %v528_v23 }
  0xd4   : > { %v413_v24 = vpop.f32.mrf.mxu1 }
  0xd6   : > { %v1043_v25 = vpop.f32.mrf.mxu1 }
  0xd8   : > { %v416_v26 = vpop.f32.mrf.mxu1  ;;  %v317_v28 = vpop.f32.mrf.mxu0 }
  0xd9   : > { %v414_v3 = vadd.f32 %v413_v24, %v317_v28 }
  0xda   : > { %v1044_v27 = vpop.f32.mrf.mxu1  ;;  %v1019_v30 = vpop.f32.mrf.mxu0 }
  0xdc   : > { %v421_v29 = vpop.f32.mrf.mxu1  ;;  %v320_v32 = vpop.f32.mrf.mxu0 }
  0xdd   : > { %v417_v10 = vadd.f32 %v416_v26, %v320_v32 }
  0xde   : > { %v1047_v31 = vpop.f32.mrf.mxu1  ;;  %v1020_v34 = vpop.f32.mrf.mxu0 }
  0xe0   : > { %v1308_v33 = vpop.f32.mrf.mxu1  ;;  %v325_v36 = vpop.f32.mrf.mxu0 }
  0xe1   : > { %v422_v18 = vadd.f32 %v421_v29, %v325_v36 }
  0xe2   : > { %v1048_v35 = vpop.f32.mrf.mxu1  ;;  %v1023_v1 = vpop.f32.mrf.mxu0 }
  0xe4   : > { %v1310_v37 = vpop.f32.mrf.mxu1  ;;  %v328_v39 = vpop.f32.mrf.mxu0 }
  0xe5   : > { %v425_v29 = vadd.f32 %v1308_v33, %v328_v39 }
  0xe6   : > { %v1051_v38 = vpop.f32.mrf.mxu1  ;;  %v1024_v41 = vpop.f32.mrf.mxu0 }
  0xe8   : > { %v1312_v40 = vpop.f32.mrf.mxu1  ;;  %v1314_v43 = vpop.f32.mrf.mxu0 }
  0xea   : > { %v1052_v42 = vpop.f32.mrf.mxu1  ;;  %v1027_v45 = vpop.f32.mrf.mxu0 }
  0xeb   : > { %v430_v45 = vadd.f32 %v1310_v37, %v1314_v43 }
  0xec   : > { %v1316_v44 = vpop.f32.mrf.mxu1  ;;  %v1318_v47 = vpop.f32.mrf.mxu0 }
  0xee   : > { %v1055_v46 = vpop.f32.mrf.mxu1  ;;  %v1028_v49 = vpop.f32.mrf.mxu0 }
  0xf0   : > { %v1320_v48 = vpop.f32.mrf.mxu1  ;;  %v1322_v51 = vpop.f32.mrf.mxu0 }
  0xf2   : > { %v1056_v50 = vpop.f32.mrf.mxu1  ;;  %v1031_v53 = vpop.f32.mrf.mxu0 }
  0xf4   : > { %v1324_v52 = vpop.f32.mrf.mxu1  ;;  %v1326_v55 = vpop.f32.mrf.mxu0 }
  0xf6   : > { %v1059_v54 = vpop.f32.mrf.mxu1  ;;  %v1032_v57 = vpop.f32.mrf.mxu0 }
  0xf8   : > { %v448_v56 = vpop.f32.mrf.mxu1  ;;  %v1328_v59 = vpop.f32.mrf.mxu0 }
  0xfa   : > { %v1060_v58 = vpop.f32.mrf.mxu1  ;;  %v1035_v61 = vpop.f32.mrf.mxu0 }
  0xfc   : > { %v716_v60 = vpop.f32.mrf.mxu1  ;;  %v352_v63 = vpop.f32.mrf.mxu0 }
  0xfe   : > { %v1091_v62 = vpop.f32.mrf.mxu1  ;;  %v1036_v2 = vpop.f32.mrf.mxu0 }
 0x100   : > { %v719_v0 = vpop.f32.mrf.mxu1  ;;  %v590_v5 = vpop.f32.mrf.mxu0 }
 0x101   : > { %v628_v6 = vadd.f32 %v590_v5, %v414_v3 }
 0x102   : > { %v1092_v4 = vpop.f32.mrf.mxu1  ;;  %v1067_v9 = vpop.f32.mrf.mxu0 }
 0x103   : > { %v754_v11 = vadd.f32 %v716_v60, %v628_v6  ;;  %v433_v60 = vadd.f32 %v1312_v40, %v1318_v47  ;;  %v438_v6 = vadd.f32 %v1316_v44, %v1322_v51 }
 0x104   : > { %v724_v7 = vpop.f32.mrf.mxu1  ;;  %v593_v13 = vpop.f32.mrf.mxu0 }
 0x105   : > { %v770_v14 = vadd.f32 %v1333_v8, %v754_v11  ;;  %v629_v15 = vadd.f32 %v593_v13, %v417_v10 }
 0x106   : > { %v1095_v12 = vpop.f32.mrf.mxu1  ;;  %v1068_v17 = vpop.f32.mrf.mxu0 }
 0x107   : > { %vm779_vm5 = vcmp.gt.f32.partialorder %v770_v14, 0.0  ;;  %v788_v19 = vmul.f32 0.1, %v770_v14  ;;  %v755_v20 = vadd.f32 %v719_v0, %v629_v15 }
 0x108   : > { %v727_v16 = vpop.f32.mrf.mxu1  ;;  %v598_v22 = vpop.f32.mrf.mxu0 }
 0x109   : > { %v797_v23 = vsel %vm779_vm5, %v770_v14, %v788_v19  ;;  %v771_v24 = vadd.f32 %v1333_v8, %v755_v20  ;;  %v630_v25 = vadd.f32 %v598_v22, %v422_v18 }
 0x10a   : > { %v1096_v21 = vpop.f32.mrf.mxu1  ;;  %v976_v27 = vpack.c.bf16 %v797_v23, %v797_v23  ;;  %v1071_v28 = vpop.f32.mrf.mxu0 }
 0x10b   : > { %vm780_vm7 = vcmp.gt.f32.partialorder %v771_v24, 0.0  ;;  %v789_v30 = vmul.f32 0.1, %v771_v24  ;;  %v756_v31 = vadd.f32 %v724_v7, %v630_v25  ;;  %v446_v25 = vadd.f32 %v1324_v52, %v1328_v59 }
 0x10c   : > { %v732_v26 = vpop.f32.mrf.mxu1  ;;  %844 = vst.msk [vmem:[%s1340_s14] sm:$0xf] %vm843_vm6, %v976_v27  ;;  %v601_v34 = vpop.f32.mrf.mxu0 }
 0x10d   : > { %v798_v35 = vsel %vm780_vm7, %v771_v24, %v789_v30  ;;  %v772_v36 = vadd.f32 %v1333_v8, %v756_v31  ;;  %v631_v1 = vadd.f32 %v601_v34, %v425_v29 }
 0x10e   : > { %v1099_v32 = vpop.f32.mrf.mxu1  ;;  %v977_v41 = vpack.c.bf16 %v798_v35, %v798_v35  ;;  %v1072_v42 = vpop.f32.mrf.mxu0 }
 0x10f   : > { %vm781_vm8 = vcmp.gt.f32.partialorder %v772_v36, 0.0  ;;  %v790_v33 = vmul.f32 0.1, %v772_v36  ;;  %v757_v39 = vadd.f32 %v727_v16, %v631_v1  ;;  %v441_v16 = vadd.f32 %v1320_v48, %v1326_v55 }
 0x110   : > { %v735_v38 = vpop.f32.mrf.mxu1  ;;  %845 = vst.msk [vmem:[%s1340_s14 + $0x4] sm:$0xf] %vm843_vm6, %v977_v41  ;;  %v606_v49 = vpop.f32.mrf.mxu0 }
 0x111   : > { %v799_v50 = vsel %vm781_vm8, %v772_v36, %v790_v33  ;;  %v773_v53 = vadd.f32 %v1333_v8, %v757_v39  ;;  %v632_v54 = vadd.f32 %v606_v49, %v430_v45 }
 0x112   : > { %v1100_v46 = vpop.f32.mrf.mxu1  ;;  %v978_v57 = vpack.c.bf16 %v799_v50, %v799_v50  ;;  %v1075_v58 = vpop.f32.mrf.mxu0 }
 0x113   : > { %vm782_vm9 = vcmp.gt.f32.partialorder %v773_v53, 0.0  ;;  %v791_v37 = vmul.f32 0.1, %v773_v53  ;;  %v758_v43 = vadd.f32 %v732_v26, %v632_v54 }
 0x114   : > { %v740_v56 = vpop.f32.mrf.mxu1  ;;  %846 = vst.msk [vmem:[%s1340_s14 + $0x8] sm:$0xf] %vm843_vm6, %v978_v57  ;;  %v609_v62 = vpop.f32.mrf.mxu0 }
 0x115   : > { %v800_v63 = vsel %vm782_vm9, %v773_v53, %v791_v37  ;;  %v774_v0 = vadd.f32 %v1333_v8, %v758_v43  ;;  %v633_v2 = vadd.f32 %v609_v62, %v433_v60 }
 0x116   : > { %v1103_v61 = vpop.f32.mrf.mxu1  ;;  %v979_v4 = vpack.c.bf16 %v800_v63, %v800_v63  ;;  %v1076_v5 = vpop.f32.mrf.mxu0 }
 0x117   : > { %vm783_vm10 = vcmp.gt.f32.partialorder %v774_v0, 0.0  ;;  %v792_v40 = vmul.f32 0.1, %v774_v0  ;;  %v759_v47 = vadd.f32 %v735_v38, %v633_v2 }
 0x118   : > { %v743_v3 = vpop.f32.mrf.mxu1  ;;  %847 = vst.msk [vmem:[%s1340_s14 + $0xc] sm:$0xf] %vm843_vm6, %v979_v4  ;;  %v614_v9 = vpop.f32.mrf.mxu0 }
 0x119   : > { %v801_v10 = vsel %vm783_vm10, %v774_v0, %v792_v40  ;;  %v775_v11 = vadd.f32 %v1333_v8, %v759_v47  ;;  %v634_v12 = vadd.f32 %v614_v9, %v438_v6 }
 0x11a   : > { %v1104_v7 = vpop.f32.mrf.mxu1  ;;  %v980_v14 = vpack.c.bf16 %v801_v10, %v801_v10  ;;  %v1079_v15 = vpop.f32.mrf.mxu0 }
 0x11b   : > { %vm784_vm11 = vcmp.gt.f32.partialorder %v775_v11, 0.0  ;;  %v793_v44 = vmul.f32 0.1, %v775_v11  ;;  %v760_v51 = vadd.f32 %v740_v56, %v634_v12 }
 0x11c   : > { %v748_v13 = vpop.f32.mrf.mxu1  ;;  %848 = vst.msk [vmem:[%s1340_s14 + $0x10] sm:$0xf] %vm843_vm6, %v980_v14  ;;  %v617_v18 = vpop.f32.mrf.mxu0 }
 0x11d   : > { %v802_v19 = vsel %vm784_vm11, %v775_v11, %v793_v44  ;;  %v776_v20 = vadd.f32 %v1333_v8, %v760_v51  ;;  %v635_v21 = vadd.f32 %v617_v18, %v441_v16 }
 0x11e   : > { %v1107_v17 = vpop.f32.mrf.mxu1  ;;  %v981_v23 = vpack.c.bf16 %v802_v19, %v802_v19  ;;  %v1080_v24 = vpop.f32.mrf.mxu0 }
 0x11f   : > { %vm785_vm12 = vcmp.gt.f32.partialorder %v776_v20, 0.0  ;;  %v794_v48 = vmul.f32 0.1, %v776_v20  ;;  %v761_v55 = vadd.f32 %v743_v3, %v635_v21 }
 0x120   : > { %v751_v22 = vpop.f32.mrf.mxu1  ;;  %849 = vst.msk [vmem:[%s1340_s14 + $0x14] sm:$0xf] %vm843_vm6, %v981_v23  ;;  %v622_v27 = vpop.f32.mrf.mxu0 }
 0x121   : > { %v803_v28 = vsel %vm785_vm12, %v776_v20, %v794_v48  ;;  %v777_v29 = vadd.f32 %v1333_v8, %v761_v55  ;;  %v636_v30 = vadd.f32 %v622_v27, %v446_v25 }
 0x122   : > { %v1108_v26 = vpop.f32.mrf.mxu1  ;;  %v982_v31 = vpack.c.bf16 %v803_v28, %v803_v28  ;;  %v1083_v32 = vpop.f32.mrf.mxu0 }
 0x123   : > { %vm786_vm13 = vcmp.gt.f32.partialorder %v777_v29, 0.0  ;;  %v795_v34 = vmul.f32 0.1, %v777_v29  ;;  %v762_v35 = vadd.f32 %v748_v13, %v636_v30 }
 0x124   : > { %850 = vst.msk [vmem:[%s1340_s14 + $0x18] sm:$0xf] %vm843_vm6, %v982_v31  ;;  %v625_v52 = vpop.f32.mrf.mxu0 }
 0x125   : > { %v804_v59 = vsel %vm786_vm13, %v777_v29, %v795_v34  ;;  %v778_v36 = vadd.f32 %v1333_v8, %v762_v35 }
 0x126   : > { %v983_v1 = vpack.c.bf16 %v804_v59, %v804_v59  ;;  %v1084_v38 = vpop.f32.mrf.mxu0 }
 0x127   : > { %vm787_vm14 = vcmp.gt.f32.partialorder %v778_v36, 0.0  ;;  %v796_v41 = vmul.f32 0.1, %v778_v36 }
 0x128   : > { %851 = vst.msk [vmem:[%s1340_s14 + $0x1c] sm:$0xf] %vm843_vm6, %v983_v1 }
 0x129   : > { %v805_v42 = vsel %vm787_vm14, %v778_v36, %v796_v41 }
 0x12a   : > { %v984_v45 = vpack.c.bf16 %v805_v42, %v805_v42 }
 0x12c   : > { %852 = vst.msk [vmem:[%s1340_s14 + $0x20] sm:$0xf] %vm843_vm6, %v984_v45 }
 0x12d PF: > { %s13_s12 = sadd.s32 1, %s1147_s12  }
 0x12e   : > { %p10_p4 = scmp.ge.s32.totalorder %s13_s12, 4  }
 0x130   :  { %12 = sbr.rel (!%p10_p4) target bundleno = 1 (0x1), region = 65 }

// kernel: flownet_s_forward.4
= control target key start
LH: loop header
LB: loop body
LE: loop exit
PB: predicated region body
PF: predicated region fallthrough
CT: control target
= control target key end

     0   :  { %s891_s12 = smov 0   ;;  %s982_s0 = inlined_call_operand.vmem [shape: bf16[2,30,64], index: 0, kind: input, shape index: {}]   ;;  %s983_s1 = inlined_call_operand.vmem [shape: bf16[4,64,32], index: 1, kind: input, shape index: {}]   ;;  %s984_s2 = inlined_call_operand.vmem [shape: f32[1,32], index: 2, kind: input, shape index: {}]   ;;  %s985_s3 = inlined_call_operand.vmem [shape: bf16[2,20,32], index: 3, kind: output, shape index: {}]  }
   0x1 LB: > { %s688_s13 = sadd.s32 4294967295, %s869_s12   ;;  %p692_p0 = scmp.ge.s32.totalorder %s869_s12, 1  ;;  %s869_s12 = sphi %s891_s12, %s13_s12  }
   0x2   : > { %p137_p1 = scmp.lt.s32.totalorder %s869_s12, 3 }
   0x4   : > { %p138_p2 = pnand %p692_p0, %p137_p1 }
   0x5   : > { %p161_p3 = scmp.lt.s32.totalorder (!%p138_p2), %s688_s13, 1 }
   0x6   : > { %141 = sbr.rel (%p138_p2) target bundleno = 255 (0xff), region = 32 }
   0xb   : > { %v841_v0 = vld [vmem:[%s983_s1 + $0x38] sm:$0xff]   ;;  %v843_v2 = vld [vmem:[%s983_s1 + $0x30] sm:$0xff]   ;;  %s987_s13 = smov (!%p161_p3, %s688_s13), 1  ;;  %v845_v4 = vld [vmem:[%s983_s1 + $0x28] sm:$0xff]   ;;  %vm241_vm0 = vcmask 523264   ;;  %vm511_vm2 = vcmask 1044480  }
   0xc   : > { %v842_v1 = vld [vmem:[%s983_s1 + $0x18] sm:$0xff]   ;;  %784 = vmatprep.subr.bf16.mxu0 %v841_v0  ;;  %v844_v3 = vld [vmem:[%s983_s1 + $0x10] sm:$0xff]   ;;  %s756_s24 = sshll.u32 %s987_s13, 4  ;;  %v846_v5 = vld [vmem:[%s983_s1 + $0x8] sm:$0xff]   ;;  %vm201_vm1 = vsmask.f32 7424 }
   0xd   : > { %796 = vmatprep.subr.bf16.mxu1 %v842_v1  ;;  %785 = vmatpush3.bf16.msra.mxu0 %v841_v0  ;;  %s923_s29 = scalar_lea.vmem %s982_s0, %s756_s24  ;;  %v847_v6 = vld [vmem:[%s983_s1 + $0x20] sm:$0xff]   ;;  %v852_v10 = vld [vmem:[%s983_s1 + $0x58] sm:$0xff]   ;;  %v854_v21 = vld [vmem:[%s983_s1 + $0x50] sm:$0xff]   ;;  %vm399_vm3 = vsmask.f32 5376  ;;  %s832_s27 = smul.u32 12, %s987_s13 }
   0xe   : > { %797 = vmatpush3.bf16.msra.mxu1 %v842_v1  ;;  %786 = vmatprep.subr.bf16.mxu0 %v843_v2  ;;  %v848_v7 = vld [vmem:[%s983_s1] sm:$0xff]   ;;  %v850_v9 = vld [vmem:[%s923_s29 + $0x8] ss:$0 sps:$4 sm:$0x77]   ;;  %v853_v18 = vld [vmem:[%s983_s1 + $0x78] sm:$0xff]   ;;  %vm631_vm5 = vcmask 254976  }
   0xf   : > { %798 = vmatprep.subr.bf16.mxu1 %v844_v3  ;;  %v849_v8 = vld [vmem:[%s923_s29] sm:$0xff]   ;;  %v210_v13 = vshll.u32 %v850_v9, 16  ;;  %v214_v14 = vshrl.u32 %v850_v9, 16  ;;  %v851_v17 = vld [vmem:[%s923_s29 + $0x8] ss:$0 sps:$4 sm:$0x33]   ;;  %s170_s30 = scalar_lea.vmem %s985_s3, %s832_s27 }
  0x10   : > { %v203_v11 = vshrl.u32 %v849_v8, 16  ;;  %v205_v12 = vshll.u32 %v849_v8, 16  ;;  %804 = vmatprep.mubr.msk.bf16.mxu1 %vm241_vm0, %v849_v8  ;;  %v855_v23 = vld [vmem:[%s983_s1 + $0x70] sm:$0xff]   ;;  %v376_v24 = vld [vmem:[%s923_s29] sm:$0xc]  ;;  %v856_v28 = vld [vmem:[%s983_s1 + $0x48] sm:$0xff]  }
  0x11   : > { %787 = vmatpush3.bf16.msra.mxu0 %v843_v2  ;;  %v212_v16 = vrot.slane %v210_v13, 1  ;;  %v377_v25 = vld [vmem:[%s923_s29 + $0x4] sm:$0xf]  ;;  %v861_v27 = vld [vmem:[%s923_s29 + $0x8] sm:$0x1f]   ;;  %vm628_vm7 = vcmask 257024  }
  0x12   : > { %799 = vmatpush3.bf16.msra.mxu1 %v844_v3  ;;  %788 = vmatprep.subr.bf16.mxu0 %v845_v4  ;;  %v207_v15 = vrot.slane %v205_v12, 1  ;;  %v727_v26 = vcombine.low %v376_v24, %v377_v25  ;;  %v857_v29 = vld [vmem:[%s983_s1 + $0x68] sm:$0xff]   ;;  %v498_v30 = vld [vmem:[%s923_s29] sm:$0x8]  ;;  %v409_v33 = vshrl.u32 %v861_v27, 16  ;;  %v412_v34 = vshll.u32 %v861_v27, 16 }
  0x13   : > { %800 = vmatprep.subr.bf16.mxu1 %v846_v5  ;;  %v216_v20 = vor.u32 %v214_v14, %v212_v16  ;;  %v743_v35 = vcombine.low %v498_v30, %v377_v25  ;;  %v513_v36 = vrot.slane %v861_v27, 3  ;;  %v858_v41 = vld [vmem:[%s983_s1 + $0x40] sm:$0xff]  }
  0x14   : > { %v208_v19 = vor.u32 %v207_v15, %v203_v11  ;;  %v401_v31 = vshrl.u32 %v727_v26, 16  ;;  %v404_v32 = vshll.u32 %v727_v26, 16  ;;  %v411_v39 = vrot.slane %v409_v33, 2  ;;  %v859_v42 = vld [vmem:[%s983_s1 + $0x60] sm:$0xff]  }
  0x15   : > { %789 = vmatpush3.bf16.msra.mxu0 %v845_v4  ;;  %v414_v40 = vrot.slane %v412_v34, 3  ;;  %v512_v43 = vrot.slane %v743_v35, 3  ;;  %v750_v61 = vld [vmem:[%s984_s2] ss:$0 sm:$0xff] }
  0x16   : > { %801 = vmatpush3.bf16.msra.mxu1 %v846_v5  ;;  %790 = vmatprep.subr.bf16.mxu0 %v847_v6  ;;  %v213_v22 = vsel %vm201_vm1, %v208_v19, %v212_v16  ;;  %v403_v37 = vrot.slane %v401_v31, 2  ;;  %v406_v38 = vrot.slane %v404_v32, 3 }
  0x17   : > { %802 = vmatprep.subr.bf16.mxu1 %v848_v7  ;;  %792 = vmatprep.mubr.msk.bf16.mxu0 %vm241_vm0, %v213_v22  ;;  %v415_v45 = vor.u32 %v414_v40, %v411_v39  ;;  %v514_v46 = vsel %vm511_vm2, %v512_v43, %v513_v36 }
  0x18   : > { %v407_v44 = vor.u32 %v406_v38, %v403_v37 }
  0x19   : > { %791 = vmatpush3.bf16.msra.mxu0 %v847_v6 }
  0x1a   : > { %803 = vmatpush3.bf16.msra.mxu1 %v848_v7  ;;  %808 = vmatprep.subr.bf16.mxu0 %v852_v10  ;;  %v416_v47 = vsel %vm399_vm3, %v407_v44, %v415_v45 }
  0x1b   : > { %820 = vmatprep.subr.bf16.mxu1 %v853_v18 }
  0x1c   : > { %793 = vmatmul.mubr.msk.bf16.vlgmr.msra.gmra.mxu0 %vm241_vm0, %v216_v20 }
  0x1d   : > { %805 = vmatmul.mubr.msk.bf16.vlgmr.msra.gmra.mxu1 %vm241_vm0, %v851_v17  ;;  %809 = vmatpush3.bf16.msra.mxu0 %v852_v10 }
  0x1e   : > { %821 = vmatpush3.bf16.msra.mxu1 %v853_v18  ;;  %810 = vmatprep.subr.bf16.mxu0 %v854_v21 }
  0x1f   : > { %822 = vmatprep.subr.bf16.mxu1 %v855_v23  ;;  %816 = vmatprep.mubr.msk.bf16.mxu0 %vm241_vm0, %v416_v47 }
  0x20   : > { %828 = vmatprep.mubr.msk.bf16.mxu1 %vm241_vm0, %v514_v46 }
  0x21   : > { %811 = vmatpush3.bf16.msra.mxu0 %v854_v21 }
  0x22   : > { %823 = vmatpush3.bf16.msra.mxu1 %v855_v23  ;;  %812 = vmatprep.subr.bf16.mxu0 %v856_v28 }
  0x23   : > { %824 = vmatprep.subr.bf16.mxu1 %v857_v29 }
  0x25   : > { %813 = vmatpush3.bf16.msra.mxu0 %v856_v28 }
  0x26   : > { %825 = vmatpush3.bf16.msra.mxu1 %v857_v29  ;;  %814 = vmatprep.subr.bf16.mxu0 %v858_v41 }
  0x27   : > { %826 = vmatprep.subr.bf16.mxu1 %v859_v42 }
  0x29   : > { %815 = vmatpush3.bf16.msra.mxu0 %v858_v41 }
  0x2a   : > { %827 = vmatpush3.bf16.msra.mxu1 %v859_v42 }
  0x2c   : > { %817 = vmatmul.mubr.msk.bf16.vlgmr.msra.gmra.mxu0 %vm241_vm0, %v415_v45 }
  0x2d   : > { %829 = vmatmul.mubr.msk.bf16.vlgmr.msra.gmra.mxu1 %vm241_vm0, %v513_v36 }
  0xdc   : > { %v794_v48 = vpop.f32.mrf.mxu0 }
  0xdd   : > { %v806_v49 = vpop.f32.mrf.mxu1 }
  0xde   : > { %v282_v50 = vpop.f32.mrf.mxu0  ;;  %v371_v56 = vadd.f32 %v806_v49, %v794_v48 }
  0xdf   : > { %v362_v51 = vpop.f32.mrf.mxu1 }
  0xe0   : > { %v795_v52 = vpop.f32.mrf.mxu0  ;;  %v363_v59 = vadd.f32 %v362_v51, %v282_v50 }
  0xe1   : > { %v807_v53 = vpop.f32.mrf.mxu1 }
  0xe2   : > { %v285_v54 = vpop.f32.mrf.mxu0 }
  0xe3   : > { %v365_v55 = vpop.f32.mrf.mxu1 }
  0xe4   : > { %v366_v4 = vadd.f32 %v365_v55, %v285_v54 }
  0xec   : > { %v818_v57 = vpop.f32.mrf.mxu0 }
  0xed   : > { %v830_v58 = vpop.f32.mrf.mxu1  ;;  %v497_v60 = vadd.f32 %v818_v57, %v371_v56 }
  0xee   : > { %v481_v62 = vpop.f32.mrf.mxu0 }
  0xef   : > { %v579_v63 = vpop.f32.mrf.mxu1  ;;  %v595_v0 = vadd.f32 %v830_v58, %v497_v60  ;;  %v495_v1 = vadd.f32 %v481_v62, %v363_v59 }
  0xf0   : > { %v819_v2 = vpop.f32.mrf.mxu0 }
  0xf1   : > { %v831_v3 = vpop.f32.mrf.mxu1  ;;  %v605_v5 = vadd.f32 %v750_v61, %v595_v0  ;;  %v593_v6 = vadd.f32 %v579_v63, %v495_v1 }
  0xf2   : > { %v484_v7 = vpop.f32.mrf.mxu0 }
  0xf3   : > { %vm608_vm4 = vcmp.gt.f32.partialorder %v605_v5, 0.0  ;;  %v611_v8 = vmul.f32 0.1, %v605_v5  ;;  %v603_v9 = vadd.f32 %v750_v61, %v593_v6  ;;  %v496_v10 = vadd.f32 %v484_v7, %v366_v4  ;;  %v582_v11 = vpop.f32.mrf.mxu1 }
  0xf5   : > { %v614_v12 = vsel %vm608_vm4, %v605_v5, %v611_v8  ;;  %vm606_vm6 = vcmp.gt.f32.partialorder %v603_v9, 0.0  ;;  %v609_v13 = vmul.f32 0.1, %v603_v9  ;;  %v594_v14 = vadd.f32 %v582_v11, %v496_v10 }
  0xf6   : > { %v759_v15 = vpack.c.bf16 %v614_v12, %v614_v12 }
  0xf7   : > { %v612_v16 = vsel %vm606_vm6, %v603_v9, %v609_v13  ;;  %v604_v17 = vadd.f32 %v750_v61, %v594_v14 }
  0xf8   : > { %632 = vst.msk [vmem:[%s170_s30 + $0x8] sm:$0x3] %vm631_vm5, %v759_v15  ;;  %v757_v18 = vpack.c.bf16 %v612_v16, %v612_v16 }
  0xf9   : > { %vm607_vm8 = vcmp.gt.f32.partialorder %v604_v17, 0.0  ;;  %v610_v19 = vmul.f32 0.1, %v604_v17 }
  0xfa   : > { %629 = vst.msk [vmem:[%s170_s30] sm:$0xf] %vm628_vm7, %v757_v18 }
  0xfb   : > { %v613_v20 = vsel %vm607_vm8, %v604_v17, %v610_v19 }
  0xfc   : > { %v758_v21 = vpack.c.bf16 %v613_v20, %v613_v20 }
  0xfe   : > { %630 = vst.msk [vmem:[%s170_s30 + $0x4] sm:$0xf] %vm628_vm7, %v758_v21 }
  0xff PF: > { %s13_s12 = sadd.s32 1, %s869_s12  }
 0x100   : > { %p10_p4 = scmp.ge.s32.totalorder %s13_s12, 4  }
 0x102   :  { %12 = sbr.rel (!%p10_p4) target bundleno = 1 (0x1), region = 65 }

// kernel: flownet_s_forward.5
= control target key start
LH: loop header
LB: loop body
LE: loop exit
PB: predicated region body
PF: predicated region fallthrough
CT: control target
= control target key end

     0   :  { %s1318_s12 = smov 0   ;;  %s1465_s0 = inlined_call_operand.vmem [shape: bf16[2,42,32], index: 0, kind: input, shape index: {}]   ;;  %s1466_s1 = inlined_call_operand.vmem [shape: bf16[9,32,32], index: 1, kind: input, shape index: {}]   ;;  %s1467_s2 = inlined_call_operand.vmem [shape: f32[1,32], index: 2, kind: input, shape index: {}]   ;;  %s1468_s3 = inlined_call_operand.vmem [shape: bf16[2,24,32], index: 3, kind: output, shape index: {}]  }
   0x1 LB: > { %s1044_s13 = sadd.s32 4294967295, %s1296_s12   ;;  %p1048_p0 = scmp.ge.s32.totalorder %s1296_s12, 1  ;;  %s1296_s12 = sphi %s1318_s12, %s13_s12  }
   0x2   : > { %p137_p1 = scmp.lt.s32.totalorder %s1296_s12, 3 }
   0x4   : > { %p138_p2 = pnand %p1048_p0, %p137_p1 }
   0x5   : > { %p161_p3 = scmp.lt.s32.totalorder (!%p138_p2), %s1044_s13, 1 }
   0x6   : > { %141 = sbr.rel (%p138_p2) target bundleno = 267 (0x10b), region = 32 }
   0xb   : > { %v1259_v0 = vld [vmem:[%s1466_s1 + $0x18] sm:$0xff]   ;;  %v1260_v1 = vld [vmem:[%s1466_s1 + $0x8] sm:$0xff]   ;;  %v1261_v2 = vld [vmem:[%s1466_s1 + $0x10] sm:$0xff]   ;;  %s1470_s13 = smov (!%p161_p3, %s1044_s13), 1  ;;  %vm223_vm0 = vcmask 261120   ;;  %vm353_vm2 = vcmask 1046528  }
   0xc   : > { %1177 = vmatprep.subr.bf16.mxu0 %v1259_v0  ;;  %1185 = vmatprep.subr.bf16.mxu1 %v1260_v1  ;;  %v1262_v3 = vld [vmem:[%s1466_s1] sm:$0xff]   ;;  %s1249_s22 = smul.u32 24, %s1470_s13  ;;  %v1265_v4 = vld [vmem:[%s1466_s1 + $0x28] sm:$0xff]   ;;  %v1267_v5 = vld [vmem:[%s1466_s1 + $0x38] sm:$0xff]   ;;  %vm195_vm1 = vsmask.f32 7424 }
   0xd   : > { %1178 = vmatpush3.bf16.msra.mxu0 %v1259_v0  ;;  %1186 = vmatpush3.bf16.msra.mxu1 %v1260_v1  ;;  %v1269_v13 = vld [vmem:[%s1466_s1 + $0x30] sm:$0xff]   ;;  %vm439_vm3 = vcmask 1044480   ;;  %v1274_v31 = vld [vmem:[%s1466_s1 + $0x58] sm:$0xff]   ;;  %v1268_v35 = vld [vmem:[%s1466_s1 + $0x20] sm:$0xff]   ;;  %vm521_vm4 = vsmask.f32 4352 }
   0xe   : > { %1179 = vmatprep.subr.bf16.mxu0 %v1261_v2  ;;  %1187 = vmatprep.subr.bf16.mxu1 %v1262_v3  ;;  %s1347_s27 = scalar_lea.vmem %s1465_s0, %s1249_s22  ;;  %v1276_v39 = vld [vmem:[%s1466_s1 + $0x50] sm:$0xff]   ;;  %v1273_v43 = vld [vmem:[%s1466_s1 + $0x48] sm:$0xff]   ;;  %v1281_v55 = vld [vmem:[%s1466_s1 + $0x78] sm:$0xff]   ;;  %vm785_vm5 = vsmask.f32 5376  ;;  %vm703_vm6 = vcmask 1045504  }
   0xf   : > { %v172_v6 = vld [vmem:[%s1347_s27] sm:$0xf]  ;;  %v1354_v7 = vld [vmem:[%s1347_s27 + $0x4] sm:$0xf]  ;;  %v1357_v8 = vld [vmem:[%s1347_s27 + $0x8] sm:$0xf] }
  0x10   : > { %v179_v9 = vld [vmem:[%s1347_s27 + $0xc] sm:$0x1]  ;;  %v1055_v10 = vcombine.low %v172_v6, %v1354_v7  ;;  %v1061_v11 = vcombine.low %v1357_v8, %v1357_v8  ;;  %v344_v14 = vld [vmem:[%s1347_s27] sm:$0xe]  ;;  %v1098_v42 = vcombine.low %v1354_v7, %v1357_v8  ;;  %v684_v51 = vld [vmem:[%s1347_s27 + $0x4] sm:$0xc] }
  0x11   : > { %1180 = vmatpush3.bf16.msra.mxu0 %v1261_v2  ;;  %1188 = vmatpush3.bf16.msra.mxu1 %v1262_v3  ;;  %v1364_v12 = vcombine.low %v1357_v8, %v179_v9  ;;  %v1070_v17 = vcombine.low %v344_v14, %v1354_v7  ;;  %v426_v18 = vld [vmem:[%s1347_s27] sm:$0x8]  ;;  %v427_v19 = vld [vmem:[%s1347_s27 + $0xc] sm:$0x7]  ;;  %v685_v52 = vld [vmem:[%s1347_s27 + $0x8] sm:$0xf] }
  0x12   : > { %1193 = vmatprep.subr.bf16.mxu0 %v1265_v4  ;;  %1201 = vmatprep.subr.bf16.mxu1 %v1267_v5  ;;  %v197_v15 = vshrl.u32 %v1055_v10, 16  ;;  %v199_v16 = vshll.u32 %v1055_v10, 16  ;;  %v1079_v23 = vcombine.low %v426_v18, %v1354_v7  ;;  %v1080_v26 = vcombine.low %v1357_v8, %v427_v19  ;;  %v1384_v33 = vld [vmem:[%s1347_s27 + $0xc] sm:$0xf]  ;;  %v687_v56 = vld [vmem:[%s1347_s27 + $0x10] sm:$0x3] }
  0x13   : > { %1189 = vmatprep.mubr.msk.bf16.mxu1 %vm223_vm0, %v1055_v10  ;;  %v204_v20 = vshll.u32 %v1364_v12, 16  ;;  %v208_v21 = vshrl.u32 %v1364_v12, 16  ;;  %v355_v22 = vrot.slane %v1364_v12, 1  ;;  %v354_v25 = vrot.slane %v1070_v17, 1  ;;  %v686_v53 = vld [vmem:[%s1347_s27 + $0xc] sm:$0xf] }
  0x14   : > { %1190 = vmatmul.mubr.msk.bf16.vlgmr.msra.gmra.mxu1 %vm223_vm0, %v1061_v11  ;;  %v201_v24 = vrot.slane %v199_v16, 1  ;;  %v440_v28 = vrot.slane %v1079_v23, 3  ;;  %v441_v30 = vrot.slane %v1080_v26, 3  ;;  %v1089_v38 = vcombine.low %v1357_v8, %v1384_v33  ;;  %v776_v58 = vld [vmem:[%s1347_s27 + $0x10] sm:$0x7]  ;;  %v1275_v61 = vld [vmem:[%s1466_s1 + $0x40] sm:$0xff]  }
  0x15   : > { %1202 = vmatpush3.bf16.msra.mxu1 %v1267_v5  ;;  %v206_v27 = vrot.slane %v204_v20, 1  ;;  %v356_v36 = vsel %vm353_vm2, %v354_v25, %v355_v22  ;;  %v523_v40 = vshrl.u32 %v1079_v23, 16  ;;  %v526_v41 = vshll.u32 %v1079_v23, 16  ;;  %v1279_v9 = vld [vmem:[%s1466_s1 + $0x68] sm:$0xff]   ;;  %v872_v14 = vld [vmem:[%s1347_s27 + $0x4] sm:$0x8] }
  0x16   : > { %1203 = vmatprep.subr.bf16.mxu1 %v1269_v13  ;;  %v202_v29 = vor.u32 %v201_v24, %v197_v15  ;;  %v442_v37 = vsel %vm439_vm3, %v440_v28, %v441_v30  ;;  %v531_v44 = vshrl.u32 %v1089_v38, 16  ;;  %v534_v45 = vshll.u32 %v1089_v38, 16  ;;  %v1282_v16 = vld [vmem:[%s1466_s1 + $0x60] sm:$0xff]   ;;  %v1287_v19 = vld [vmem:[%s1466_s1 + $0x88] sm:$0xff]   ;;  %s1250_s4 = smul.u32 12, %s1470_s13 }
  0x17   : > { %v210_v32 = vor.u32 %v208_v21, %v206_v27  ;;  %1205 = vmatprep.mubr.msk.bf16.mxu1 %vm223_vm0, %v442_v37  ;;  %v525_v46 = vrot.slane %v523_v40, 3  ;;  %v528_v47 = vrot.slane %v526_v41, 4  ;;  %v1108_v57 = vcombine.low %v684_v51, %v685_v52 }
  0x18   : > { %v207_v34 = vsel %vm195_vm1, %v202_v29, %v206_v27  ;;  %v533_v48 = vrot.slane %v531_v44, 3  ;;  %v536_v49 = vrot.slane %v534_v45, 4  ;;  %v1099_v59 = vcombine.low %v1384_v33, %v1384_v33  ;;  %s170_s7 = scalar_lea.vmem %s1468_s3, %s1250_s4 }
  0x19   : > { %1204 = vmatpush3.bf16.msra.mxu1 %v1269_v13  ;;  %1181 = vmatprep.mubr.msk.bf16.mxu0 %vm223_vm0, %v207_v34  ;;  %v529_v50 = vor.u32 %v528_v47, %v525_v46  ;;  %v1118_v60 = vcombine.low %v686_v53, %v776_v58  ;;  %v1109_v63 = vcombine.low %v686_v53, %v687_v56  ;;  %v787_v0 = vshrl.u32 %v1108_v57, 16 }
  0x1a   : > { %1182 = vmatmul.mubr.msk.bf16.vlgmr.msra.gmra.mxu0 %vm223_vm0, %v210_v32  ;;  %1217 = vmatprep.subr.bf16.mxu1 %v1274_v31  ;;  %v537_v54 = vor.u32 %v536_v49, %v533_v48  ;;  %v790_v1 = vshll.u32 %v1108_v57, 16  ;;  %v704_v10 = vrot.slane %v1108_v57, 2  ;;  %v1127_v18 = vcombine.low %v872_v14, %v685_v52 }
  0x1b   : > { %1194 = vmatpush3.bf16.msra.mxu0 %v1265_v4  ;;  %1197 = vmatprep.mubr.msk.bf16.mxu0 %vm223_vm0, %v356_v36  ;;  %v795_v2 = vshrl.u32 %v1118_v60, 16  ;;  %v798_v3 = vshll.u32 %v1118_v60, 16  ;;  %v1283_v4 = vld [vmem:[%s1466_s1 + $0x70] sm:$0xff]   ;;  %v789_v5 = vrot.slane %v787_v0, 2  ;;  %v705_v11 = vrot.slane %v1109_v63, 2 }
  0x1c   : > { %1195 = vmatprep.subr.bf16.mxu0 %v1268_v35  ;;  %1206 = vmatmul.mubr.msk.bf16.vlgmr.msra.gmra.mxu1 %vm223_vm0, %v441_v30  ;;  %v538_v62 = vsel %vm521_vm4, %v529_v50, %v537_v54  ;;  %v792_v6 = vrot.slane %v790_v1, 3  ;;  %v881_v20 = vrot.slane %v1127_v18, 3  ;;  %v882_v21 = vrot.slane %v1118_v60, 3 }
  0x1d   : > { %1218 = vmatpush3.bf16.msra.mxu1 %v1274_v31  ;;  %1221 = vmatprep.mubr.msk.bf16.mxu1 %vm223_vm0, %v1098_v42  ;;  %v797_v7 = vrot.slane %v795_v2, 2  ;;  %v800_v8 = vrot.slane %v798_v3, 3  ;;  %v706_v17 = vsel %vm703_vm6, %v704_v10, %v705_v11  ;;  %v1132_v10 = vld [vmem:[%s1467_s2] ss:$0 sm:$0xff]  ;;  %vm985_vm8 = vcmask 257024  }
  0x1e   : > { %1219 = vmatprep.subr.bf16.mxu1 %v1276_v39  ;;  %v793_v12 = vor.u32 %v792_v6, %v789_v5  ;;  %v883_v23 = vsel %vm439_vm3, %v881_v20, %v882_v21 }
  0x1f   : > { %1196 = vmatpush3.bf16.msra.mxu0 %v1268_v35  ;;  %v801_v13 = vor.u32 %v800_v8, %v797_v7 }
  0x20   : > { %1209 = vmatprep.subr.bf16.mxu0 %v1273_v43 }
  0x21   : > { %1220 = vmatpush3.bf16.msra.mxu1 %v1276_v39  ;;  %v802_v15 = vsel %vm785_vm5, %v793_v12, %v801_v13 }
  0x22   : > { %1198 = vmatmul.mubr.msk.bf16.vlgmr.msra.gmra.mxu0 %vm223_vm0, %v355_v22  ;;  %1233 = vmatprep.subr.bf16.mxu1 %v1281_v55  ;;  %v1288_v22 = vld [vmem:[%s1466_s1 + $0x80] sm:$0xff]  }
  0x23   : > { %1210 = vmatpush3.bf16.msra.mxu0 %v1273_v43  ;;  %1213 = vmatprep.mubr.msk.bf16.mxu0 %vm223_vm0, %v538_v62 }
  0x24   : > { %1211 = vmatprep.subr.bf16.mxu0 %v1275_v61  ;;  %1222 = vmatmul.mubr.msk.bf16.vlgmr.msra.gmra.mxu1 %vm223_vm0, %v1099_v59 }
  0x25   : > { %1234 = vmatpush3.bf16.msra.mxu1 %v1281_v55  ;;  %1237 = vmatprep.mubr.msk.bf16.mxu1 %vm223_vm0, %v802_v15 }
  0x26   : > { %1235 = vmatprep.subr.bf16.mxu1 %v1283_v4 }
  0x27   : > { %1212 = vmatpush3.bf16.msra.mxu0 %v1275_v61 }
  0x28   : > { %1225 = vmatprep.subr.bf16.mxu0 %v1279_v9 }
  0x29   : > { %1236 = vmatpush3.bf16.msra.mxu1 %v1283_v4 }
  0x2a   : > { %1214 = vmatmul.mubr.msk.bf16.vlgmr.msra.gmra.mxu0 %vm223_vm0, %v537_v54 }
  0x2b   : > { %1226 = vmatpush3.bf16.msra.mxu0 %v1279_v9  ;;  %1229 = vmatprep.mubr.msk.bf16.mxu0 %vm223_vm0, %v706_v17 }
  0x2c   : > { %1227 = vmatprep.subr.bf16.mxu0 %v1282_v16  ;;  %1238 = vmatmul.mubr.msk.bf16.vlgmr.msra.gmra.mxu1 %vm223_vm0, %v801_v13 }
  0x2f   : > { %1228 = vmatpush3.bf16.msra.mxu0 %v1282_v16 }
  0x30   : > { %1241 = vmatprep.subr.bf16.mxu0 %v1287_v19 }
  0x32   : > { %1230 = vmatmul.mubr.msk.bf16.vlgmr.msra.gmra.mxu0 %vm223_vm0, %v705_v11 }
  0x33   : > { %1242 = vmatpush3.bf16.msra.mxu0 %v1287_v19  ;;  %1245 = vmatprep.mubr.msk.bf16.mxu0 %vm223_vm0, %v883_v23 }
  0x34   : > { %1243 = vmatprep.subr.bf16.mxu0 %v1288_v22 }
  0x37   : > { %1244 = vmatpush3.bf16.msra.mxu0 %v1288_v22 }
  0x3a   : > { %1246 = vmatmul.mubr.msk.bf16.vlgmr.msra.gmra.mxu0 %vm223_vm0, %v882_v21 }
  0xd4   : > { %v1191_v24 = vpop.f32.mrf.mxu1 }
  0xd6   : > { %v330_v25 = vpop.f32.mrf.mxu1 }
  0xd8   : > { %v1192_v26 = vpop.f32.mrf.mxu1 }
  0xda   : > { %v333_v27 = vpop.f32.mrf.mxu1  ;;  %v1183_v28 = vpop.f32.mrf.mxu0 }
  0xdb   : > { %v339_v41 = vadd.f32 %v1191_v24, %v1183_v28 }
  0xdc   : > { %v264_v29 = vpop.f32.mrf.mxu0  ;;  %v1207_v30 = vpop.f32.mrf.mxu1 }
  0xdd   : > { %v331_v44 = vadd.f32 %v330_v25, %v264_v29 }
  0xde   : > { %v1184_v31 = vpop.f32.mrf.mxu0  ;;  %v495_v32 = vpop.f32.mrf.mxu1 }
  0xe0   : > { %v267_v33 = vpop.f32.mrf.mxu0  ;;  %v1208_v34 = vpop.f32.mrf.mxu1 }
  0xe1   : > { %v334_v51 = vadd.f32 %v333_v27, %v267_v33 }
  0xe2   : > { %v1199_v35 = vpop.f32.mrf.mxu0  ;;  %v498_v36 = vpop.f32.mrf.mxu1 }
  0xe3   : > { %v425_v45 = vadd.f32 %v1199_v35, %v339_v41 }
  0xe4   : > { %v409_v37 = vpop.f32.mrf.mxu0  ;;  %v1223_v38 = vpop.f32.mrf.mxu1 }
  0xe5   : > { %v423_v48 = vadd.f32 %v409_v37, %v331_v44  ;;  %v511_v52 = vadd.f32 %v1207_v30, %v425_v45 }
  0xe6   : > { %v1200_v39 = vpop.f32.mrf.mxu0  ;;  %v667_v40 = vpop.f32.mrf.mxu1 }
  0xe7   : > { %v509_v55 = vadd.f32 %v495_v32, %v423_v48 }
  0xe8   : > { %v412_v42 = vpop.f32.mrf.mxu0  ;;  %v1224_v43 = vpop.f32.mrf.mxu1 }
  0xe9   : > { %v424_v56 = vadd.f32 %v412_v42, %v334_v51 }
  0xea   : > { %v1215_v46 = vpop.f32.mrf.mxu0  ;;  %v670_v47 = vpop.f32.mrf.mxu1 }
  0xeb   : > { %v607_v57 = vadd.f32 %v1215_v46, %v511_v52  ;;  %v510_v62 = vadd.f32 %v498_v36, %v424_v56 }
  0xec   : > { %v591_v49 = vpop.f32.mrf.mxu0  ;;  %v1239_v50 = vpop.f32.mrf.mxu1 }
  0xed   : > { %v605_v60 = vadd.f32 %v591_v49, %v509_v55  ;;  %v683_v63 = vadd.f32 %v1223_v38, %v607_v57 }
  0xee   : > { %v1216_v53 = vpop.f32.mrf.mxu0  ;;  %v855_v54 = vpop.f32.mrf.mxu1 }
  0xef   : > { %v681_v1 = vadd.f32 %v667_v40, %v605_v60 }
  0xf0   : > { %v594_v58 = vpop.f32.mrf.mxu0  ;;  %v1240_v59 = vpop.f32.mrf.mxu1 }
  0xf1   : > { %v606_v2 = vadd.f32 %v594_v58, %v510_v62 }
  0xf2   : > { %v1231_v61 = vpop.f32.mrf.mxu0  ;;  %v858_v17 = vpop.f32.mrf.mxu1 }
  0xf3   : > { %v775_v3 = vadd.f32 %v1231_v61, %v683_v63  ;;  %v682_v7 = vadd.f32 %v670_v47, %v606_v2 }
  0xf4   : > { %v759_v0 = vpop.f32.mrf.mxu0 }
  0xf5   : > { %v773_v5 = vadd.f32 %v759_v0, %v681_v1  ;;  %v871_v8 = vadd.f32 %v1239_v50, %v775_v3 }
  0xf6   : > { %v1232_v4 = vpop.f32.mrf.mxu0 }
  0xf7   : > { %v869_v11 = vadd.f32 %v855_v54, %v773_v5 }
  0xf8   : > { %v762_v6 = vpop.f32.mrf.mxu0 }
  0xf9   : > { %v774_v12 = vadd.f32 %v762_v6, %v682_v7 }
  0xfa   : > { %v1247_v9 = vpop.f32.mrf.mxu0 }
  0xfb   : > { %v952_v13 = vadd.f32 %v1247_v9, %v871_v8  ;;  %v870_v19 = vadd.f32 %v858_v17, %v774_v12 }
  0xfc   : > { %v936_v14 = vpop.f32.mrf.mxu0 }
  0xfd   : > { %v962_v15 = vadd.f32 %v1132_v10, %v952_v13  ;;  %v950_v16 = vadd.f32 %v936_v14, %v869_v11 }
  0xfe   : > { %v1248_v18 = vpop.f32.mrf.mxu0 }
  0xff   : > { %vm965_vm7 = vcmp.gt.f32.partialorder %v962_v15, 0.0  ;;  %v968_v20 = vmul.f32 0.1, %v962_v15  ;;  %v960_v21 = vadd.f32 %v1132_v10, %v950_v16 }
 0x100   : > { %v939_v22 = vpop.f32.mrf.mxu0 }
 0x101   : > { %v971_v23 = vsel %vm965_vm7, %v962_v15, %v968_v20  ;;  %vm963_vm9 = vcmp.gt.f32.partialorder %v960_v21, 0.0  ;;  %v966_v24 = vmul.f32 0.1, %v960_v21  ;;  %v951_v25 = vadd.f32 %v939_v22, %v870_v19 }
 0x102   : > { %v1140_v26 = vpack.c.bf16 %v971_v23, %v971_v23 }
 0x103   : > { %v969_v27 = vsel %vm963_vm9, %v960_v21, %v966_v24  ;;  %v961_v28 = vadd.f32 %v1132_v10, %v951_v25 }
 0x104   : > { %988 = vst.msk [vmem:[%s170_s7 + $0x8] sm:$0xf] %vm985_vm8, %v1140_v26  ;;  %v1138_v29 = vpack.c.bf16 %v969_v27, %v969_v27 }
 0x105   : > { %vm964_vm10 = vcmp.gt.f32.partialorder %v961_v28, 0.0  ;;  %v967_v30 = vmul.f32 0.1, %v961_v28 }
 0x106   : > { %986 = vst.msk [vmem:[%s170_s7] sm:$0xf] %vm985_vm8, %v1138_v29 }
 0x107   : > { %v970_v31 = vsel %vm964_vm10, %v961_v28, %v967_v30 }
 0x108   : > { %v1139_v32 = vpack.c.bf16 %v970_v31, %v970_v31 }
 0x10a   : > { %987 = vst.msk [vmem:[%s170_s7 + $0x4] sm:$0xf] %vm985_vm8, %v1139_v32 }
 0x10b PF: > { %s13_s12 = sadd.s32 1, %s1296_s12  }
 0x10c   : > { %p10_p4 = scmp.ge.s32.totalorder %s13_s12, 4  }
 0x10e   :  { %12 = sbr.rel (!%p10_p4) target bundleno = 1 (0x1), region = 70 }

</bundles_post_ra>
